<compile_context>
chip_gen: v7x
topology: tpu7x:2x2x1
jax: 0.10.0
libtpu: 0.0.40
codegen_flags: <defaults>
</compile_context>

<pallas_src>
import functools

import jax
import jax.numpy as jnp
from jax.experimental import pallas as pl
from jax.experimental.pallas import tpu as pltpu


def _fused_conv3d_relu_kernel(x_ref, w_ref, b_ref, mask_ref,
                              o_ref, col_ref,
                              *, k, pad, W, HW, M, halo, cin, kdim):
    """One grid step = one batch element (whole volume).

    x_ref   : (Cin, M + 2*halo)  flat spatial volume with halo padding
    w_ref   : (Cout, Kp)         flattened weights, K..Kp tail zero-padded
    b_ref   : (Cout, 1)          bias (f32)
    mask_ref: (k^3, M)           per-tap 0/1 'same'-padding border masks
    o_ref   : (Cout, M)          lane-dense output tile (f32)
    col_ref : (Kp, M)            VMEM im2col scratch
    """
    Kp = col_ref.shape[0]

    # Zero the K..Kp alignment tail (sublane-aligned start).  The matching
    # weight columns are zero too, but uninitialized scratch could hold NaNs
    # and 0 * NaN would poison the accumulator.  Any real rows overwritten by
    # the zeroing are re-filled by the tap loop below.
    if kdim < Kp:
        ztail = (kdim // 8) * 8
        col_ref[ztail:, :] = jnp.zeros((Kp - ztail, M), col_ref.dtype)

    # Fused im2col: k^3 static lane-shifted views of the flat volume; border
    # (wrap-around) positions zeroed by the precomputed multiplicative mask,
    # exactly reproducing 'same' zero padding.
    for kd in range(k):
        for kh in range(k):
            for kw in range(k):
                o = (kd * k + kh) * k + kw
                shift = (kd - pad) * HW + (kh - pad) * W + (kw - pad)
                start = halo + shift
                x_sl = x_ref[:, start:start + M]          # (Cin, M)
                m = mask_ref[o:o + 1, :]                  # (1, M) 0/1
                col_ref[o * cin:(o + 1) * cin, :] = x_sl * m

    # Single MXU GEMM + bias + ReLU epilogue on the f32 accumulator.
    acc = jnp.dot(w_ref[...], col_ref[...],
                  preferred_element_type=jnp.float32)     # (Cout, M)
    acc = acc + b_ref[...]                                # bias broadcast
    o_ref[...] = jnp.maximum(acc, 0.0).astype(o_ref.dtype)


def conv3d_relu_pallas(x, weight, bias, *, compute_dtype=jnp.float32):
    """x: (N, Cin, D, H, W); weight: (Cout, Cin, k, k, k); bias: (Cout,).

    Conv3d (stride=1, dilation=1, groups=1, 'same' padding for odd k) + ReLU.
    Returns (N, Cout, D, H, W) float32.  compute_dtype=jnp.bfloat16 halves
    HBM read traffic for the operands (recommended on v6e / v7x).
    """
    N, Cin, D, H, W = x.shape
    Cout = weight.shape[0]
    k = weight.shape[-1]
    pad = (k - 1) // 2          # matches PyTorch int((k-1)/2); odd k == 'same'
    HW = H * W
    M = D * HW
    K = Cin * k * k * k
    Kp = max(128, ((K + 127) // 128) * 128)   # lane-align contraction dim
    halo = pad * (HW + W + 1)                 # max |flat shift|
    Mp = M + 2 * halo

    # Free reshape + tiny halo pad (vs. the k^3 im2col blowup / transposes).
    x_flat = x.reshape(N, Cin, M).astype(compute_dtype)
    x_flat = jnp.pad(x_flat, ((0, 0), (0, 0), (halo, halo)))

    # Weights flattened to (Cout, Kp) with rows ordered (kd, kh, kw, ci) to
    # match the column-matrix row layout; zero-padded to the aligned Kp.
    w_mat = jnp.transpose(weight, (0, 2, 3, 4, 1)).reshape(Cout, K)
    w_mat = jnp.pad(w_mat, ((0, 0), (0, Kp - K))).astype(compute_dtype)
    b_mat = bias.reshape(Cout, 1).astype(jnp.float32)

    # Precompute per-tap border masks once on the host (tiny, VMEM-resident
    # via constant index_map): mask[o, m] == 1 iff output position m reads an
    # in-bounds input element for tap o.  Avoids in-kernel int div/mod/compare.
    m_idx = jnp.arange(M, dtype=jnp.int32)
    d_idx = m_idx // HW
    h_idx = (m_idx // W) % H
    w_idx = m_idx % W
    taps = []
    for kd in range(k):
        for kh in range(k):
            for kw in range(k):
                taps.append((d_idx >= pad - kd) & (d_idx < D + pad - kd) &
                            (h_idx >= pad - kh) & (h_idx < H + pad - kh) &
                            (w_idx >= pad - kw) & (w_idx < W + pad - kw))
    mask = jnp.stack(taps, axis=0).astype(compute_dtype)   # (k^3, M)

    kern = functools.partial(_fused_conv3d_relu_kernel, k=k, pad=pad,
                             W=W, HW=HW, M=M, halo=halo, cin=Cin, kdim=K)

    itemsize = jnp.dtype(compute_dtype).itemsize
    cost = pl.CostEstimate(
        flops=2 * N * M * K * Cout,
        transcendentals=0,
        bytes_accessed=(N * Cin * Mp * itemsize          # input (with halo)
                        + Cout * Kp * itemsize           # weights
                        + k * k * k * M * itemsize       # masks
                        + N * Cout * M * 4))             # output (f32)

    out = pl.pallas_call(
        kern,
        out_shape=jax.ShapeDtypeStruct((N, Cout, M), jnp.float32),
        grid_spec=pltpu.PrefetchScalarGridSpec(
            num_scalar_prefetch=0,
            grid=(N,),
            in_specs=[
                pl.BlockSpec((None, Cin, Mp), lambda n: (n, 0, 0)),  # x slab
                pl.BlockSpec((Cout, Kp), lambda n: (0, 0)),          # weights
                pl.BlockSpec((Cout, 1), lambda n: (0, 0)),           # bias
                pl.BlockSpec((k * k * k, M), lambda n: (0, 0)),      # masks
            ],
            out_specs=pl.BlockSpec((None, Cout, M), lambda n: (n, 0, 0)),
            scratch_shapes=[pltpu.VMEM((Kp, M), compute_dtype)],
        ),
        compiler_params=pltpu.CompilerParams(
            dimension_semantics=("parallel",),
            vmem_limit_bytes=32 * 1024 * 1024),
        cost_estimate=cost,
    )(x_flat, w_mat, b_mat, mask)

    # (N, Cout, M) -> NCDHW is a free reshape (already channel-major).
    return out.reshape(N, Cout, D, H, W)


def _reference_conv3d_relu(x, weight, bias):
    pad = (weight.shape[-1] - 1) // 2
    y = jax.lax.conv_general_dilated(
        x, weight,
        window_strides=(1, 1, 1),
        padding=[(pad, pad)] * 3,
        dimension_numbers=("NCDHW", "OIDHW", "NCDHW"),
    )
    y = y + bias.reshape(1, -1, 1, 1, 1)
    return jnp.maximum(y, 0.0)


if __name__ == "__main__":
    # ConBnRelDp(in_ch=4, out_ch=8, kernel_size=3)  [dim=3 default]
    in_ch, out_ch, ksize = 4, 8, 3
    N, D, H, W = 2, 8, 8, 8

    key = jax.random.PRNGKey(0)
    k_x, k_w, k_b = jax.random.split(key, 3)
    x = jax.random.normal(k_x, (N, in_ch, D, H, W), dtype=jnp.float32)
    weight = 0.1 * jax.random.normal(
        k_w, (out_ch, in_ch, ksize, ksize, ksize), dtype=jnp.float32)
    bias = 0.05 * jax.random.normal(k_b, (out_ch,), dtype=jnp.float32)

    y_ref = _reference_conv3d_relu(x, weight, bias)

    # f32 operand path (tight check).
    y = jax.block_until_ready(conv3d_relu_pallas(x, weight, bias))
    assert y.shape == (N, out_ch, D, H, W)
    assert jnp.allclose(y, y_ref, atol=1e-4, rtol=1e-4), "f32 mismatch vs ref"

    # bf16 operand path (halves HBM reads on v6e/v7x); looser tolerance.
    y_bf16 = jax.block_until_ready(
        conv3d_relu_pallas(x, weight, bias, compute_dtype=jnp.bfloat16))
    assert jnp.allclose(y_bf16, y_ref, atol=5e-2, rtol=5e-2), "bf16 mismatch"

    print("KERNEL_OK")
</pallas_src>

<mosaic_0001>
module attributes {stable_mosaic.version = 11 : i64} {
  func.func @_fused_conv3d_relu_kernel(%arg0: i32, %arg1: memref<1x4x658xf32, #tpu.memory_space<vmem>>, %arg2: memref<8x128xf32, #tpu.memory_space<vmem>>, %arg3: memref<8x1xf32, #tpu.memory_space<vmem>>, %arg4: memref<27x512xf32, #tpu.memory_space<vmem>>, %arg5: memref<1x8x512xf32, #tpu.memory_space<vmem>>, %arg6: memref<128x512xf32, #tpu.memory_space<vmem>>) attributes {dimension_semantics = [#tpu.dimension_semantics<parallel>], iteration_bounds = array<i64: 2>, scalar_prefetch = 0 : i64, scratch_operands = 1 : i64, tpu.core_type = #tpu.core_type<tc>, window_params = [{transform_indices = @transform_0, window_bounds = array<i64: 1, 4, 658>}, {pipeline_mode = #tpu.pipeline_mode<synchronous>, transform_indices = @transform_1, window_bounds = array<i64: 8, 128>}, {pipeline_mode = #tpu.pipeline_mode<synchronous>, transform_indices = @transform_2, window_bounds = array<i64: 8, 1>}, {pipeline_mode = #tpu.pipeline_mode<synchronous>, transform_indices = @transform_3, window_bounds = array<i64: 27, 512>}, {transform_indices = @transform_4, window_bounds = array<i64: 1, 8, 512>}]} {
    %cst = arith.constant 0.000000e+00 : f32
    %0 = vector.broadcast %cst : f32 to vector<24x512xf32>
    %c104 = arith.constant 104 : index
    %c0 = arith.constant 0 : index
    %1 = vector.load %arg6[%c104, %c0] : memref<128x512xf32, #tpu.memory_space<vmem>>, vector<24x512xf32>
    tpu.vector_store %arg6[%c104, %c0], %0 {strides = array<i32>} : memref<128x512xf32, #tpu.memory_space<vmem>>, vector<24x512xf32>,
    %c0_0 = arith.constant 0 : index
    %c0_1 = arith.constant 0 : index
    %c0_2 = arith.constant 0 : index
    %2 = vector.load %arg1[%c0_0, %c0_1, %c0_2] : memref<1x4x658xf32, #tpu.memory_space<vmem>>, vector<1x4x512xf32>
    %3 = vector.shape_cast %2 : vector<1x4x512xf32> to vector<4x512xf32>
    %c0_3 = arith.constant 0 : index
    %c0_4 = arith.constant 0 : index
    %4 = vector.load %arg4[%c0_3, %c0_4] : memref<27x512xf32, #tpu.memory_space<vmem>>, vector<1x512xf32>
    %5 = vector.broadcast %4 : vector<1x512xf32> to vector<4x512xf32>
    %6 = arith.mulf %3, %5 : vector<4x512xf32>
    %c0_5 = arith.constant 0 : index
    %c0_6 = arith.constant 0 : index
    %7 = vector.load %arg6[%c0_5, %c0_6] : memref<128x512xf32, #tpu.memory_space<vmem>>, vector<4x512xf32>
    tpu.vector_store %arg6[%c0_5, %c0_6], %6 {strides = array<i32>} : memref<128x512xf32, #tpu.memory_space<vmem>>, vector<4x512xf32>,
    %c0_7 = arith.constant 0 : index
    %c0_8 = arith.constant 0 : index
    %c1 = arith.constant 1 : index
    %8 = vector.load %arg1[%c0_7, %c0_8, %c1] : memref<1x4x658xf32, #tpu.memory_space<vmem>>, vector<1x4x512xf32>
    %9 = vector.shape_cast %8 : vector<1x4x512xf32> to vector<4x512xf32>
    %c1_9 = arith.constant 1 : index
    %c0_10 = arith.constant 0 : index
    %10 = vector.load %arg4[%c1_9, %c0_10] : memref<27x512xf32, #tpu.memory_space<vmem>>, vector<1x512xf32>
    %11 = vector.broadcast %10 : vector<1x512xf32> to vector<4x512xf32>
    %12 = arith.mulf %9, %11 : vector<4x512xf32>
    %c4 = arith.constant 4 : index
    %c0_11 = arith.constant 0 : index
    %13 = vector.load %arg6[%c4, %c0_11] : memref<128x512xf32, #tpu.memory_space<vmem>>, vector<4x512xf32>
    tpu.vector_store %arg6[%c4, %c0_11], %12 {strides = array<i32>} : memref<128x512xf32, #tpu.memory_space<vmem>>, vector<4x512xf32>,
    %c0_12 = arith.constant 0 : index
    %c0_13 = arith.constant 0 : index
    %c2 = arith.constant 2 : index
    %14 = vector.load %arg1[%c0_12, %c0_13, %c2] : memref<1x4x658xf32, #tpu.memory_space<vmem>>, vector<1x4x512xf32>
    %15 = vector.shape_cast %14 : vector<1x4x512xf32> to vector<4x512xf32>
    %c2_14 = arith.constant 2 : index
    %c0_15 = arith.constant 0 : index
    %16 = vector.load %arg4[%c2_14, %c0_15] : memref<27x512xf32, #tpu.memory_space<vmem>>, vector<1x512xf32>
    %17 = vector.broadcast %16 : vector<1x512xf32> to vector<4x512xf32>
    %18 = arith.mulf %15, %17 : vector<4x512xf32>
    %c8 = arith.constant 8 : index
    %c0_16 = arith.constant 0 : index
    %19 = vector.load %arg6[%c8, %c0_16] : memref<128x512xf32, #tpu.memory_space<vmem>>, vector<4x512xf32>
    tpu.vector_store %arg6[%c8, %c0_16], %18 {strides = array<i32>} : memref<128x512xf32, #tpu.memory_space<vmem>>, vector<4x512xf32>,
    %c0_17 = arith.constant 0 : index
    %c0_18 = arith.constant 0 : index
    %c8_19 = arith.constant 8 : index
    %20 = vector.load %arg1[%c0_17, %c0_18, %c8_19] : memref<1x4x658xf32, #tpu.memory_space<vmem>>, vector<1x4x512xf32>
    %21 = vector.shape_cast %20 : vector<1x4x512xf32> to vector<4x512xf32>
    %c3 = arith.constant 3 : index
    %c0_20 = arith.constant 0 : index
    %22 = vector.load %arg4[%c3, %c0_20] : memref<27x512xf32, #tpu.memory_space<vmem>>, vector<1x512xf32>
    %23 = vector.broadcast %22 : vector<1x512xf32> to vector<4x512xf32>
    %24 = arith.mulf %21, %23 : vector<4x512xf32>
    %c12 = arith.constant 12 : index
    %c0_21 = arith.constant 0 : index
    %25 = vector.load %arg6[%c12, %c0_21] : memref<128x512xf32, #tpu.memory_space<vmem>>, vector<4x512xf32>
    tpu.vector_store %arg6[%c12, %c0_21], %24 {strides = array<i32>} : memref<128x512xf32, #tpu.memory_space<vmem>>, vector<4x512xf32>,
    %c0_22 = arith.constant 0 : index
    %c0_23 = arith.constant 0 : index
    %c9 = arith.constant 9 : index
    %26 = vector.load %arg1[%c0_22, %c0_23, %c9] : memref<1x4x658xf32, #tpu.memory_space<vmem>>, vector<1x4x512xf32>
    %27 = vector.shape_cast %26 : vector<1x4x512xf32> to vector<4x512xf32>
    %c4_24 = arith.constant 4 : index
    %c0_25 = arith.constant 0 : index
    %28 = vector.load %arg4[%c4_24, %c0_25] : memref<27x512xf32, #tpu.memory_space<vmem>>, vector<1x512xf32>
    %29 = vector.broadcast %28 : vector<1x512xf32> to vector<4x512xf32>
    %30 = arith.mulf %27, %29 : vector<4x512xf32>
    %c16 = arith.constant 16 : index
    %c0_26 = arith.constant 0 : index
    %31 = vector.load %arg6[%c16, %c0_26] : memref<128x512xf32, #tpu.memory_space<vmem>>, vector<4x512xf32>
    tpu.vector_store %arg6[%c16, %c0_26], %30 {strides = array<i32>} : memref<128x512xf32, #tpu.memory_space<vmem>>, vector<4x512xf32>,
    %c0_27 = arith.constant 0 : index
    %c0_28 = arith.constant 0 : index
    %c10 = arith.constant 10 : index
    %32 = vector.load %arg1[%c0_27, %c0_28, %c10] : memref<1x4x658xf32, #tpu.memory_space<vmem>>, vector<1x4x512xf32>
    %33 = vector.shape_cast %32 : vector<1x4x512xf32> to vector<4x512xf32>
    %c5 = arith.constant 5 : index
    %c0_29 = arith.constant 0 : index
    %34 = vector.load %arg4[%c5, %c0_29] : memref<27x512xf32, #tpu.memory_space<vmem>>, vector<1x512xf32>
    %35 = vector.broadcast %34 : vector<1x512xf32> to vector<4x512xf32>
    %36 = arith.mulf %33, %35 : vector<4x512xf32>
    %c20 = arith.constant 20 : index
    %c0_30 = arith.constant 0 : index
    %37 = vector.load %arg6[%c20, %c0_30] : memref<128x512xf32, #tpu.memory_space<vmem>>, vector<4x512xf32>
    tpu.vector_store %arg6[%c20, %c0_30], %36 {strides = array<i32>} : memref<128x512xf32, #tpu.memory_space<vmem>>, vector<4x512xf32>,
    %c0_31 = arith.constant 0 : index
    %c0_32 = arith.constant 0 : index
    %c16_33 = arith.constant 16 : index
    %38 = vector.load %arg1[%c0_31, %c0_32, %c16_33] : memref<1x4x658xf32, #tpu.memory_space<vmem>>, vector<1x4x512xf32>
    %39 = vector.shape_cast %38 : vector<1x4x512xf32> to vector<4x512xf32>
    %c6 = arith.constant 6 : index
    %c0_34 = arith.constant 0 : index
    %40 = vector.load %arg4[%c6, %c0_34] : memref<27x512xf32, #tpu.memory_space<vmem>>, vector<1x512xf32>
    %41 = vector.broadcast %40 : vector<1x512xf32> to vector<4x512xf32>
    %42 = arith.mulf %39, %41 : vector<4x512xf32>
    %c24 = arith.constant 24 : index
    %c0_35 = arith.constant 0 : index
    %43 = vector.load %arg6[%c24, %c0_35] : memref<128x512xf32, #tpu.memory_space<vmem>>, vector<4x512xf32>
    tpu.vector_store %arg6[%c24, %c0_35], %42 {strides = array<i32>} : memref<128x512xf32, #tpu.memory_space<vmem>>, vector<4x512xf32>,
    %c0_36 = arith.constant 0 : index
    %c0_37 = arith.constant 0 : index
    %c17 = arith.constant 17 : index
    %44 = vector.load %arg1[%c0_36, %c0_37, %c17] : memref<1x4x658xf32, #tpu.memory_space<vmem>>, vector<1x4x512xf32>
    %45 = vector.shape_cast %44 : vector<1x4x512xf32> to vector<4x512xf32>
    %c7 = arith.constant 7 : index
    %c0_38 = arith.constant 0 : index
    %46 = vector.load %arg4[%c7, %c0_38] : memref<27x512xf32, #tpu.memory_space<vmem>>, vector<1x512xf32>
    %47 = vector.broadcast %46 : vector<1x512xf32> to vector<4x512xf32>
    %48 = arith.mulf %45, %47 : vector<4x512xf32>
    %c28 = arith.constant 28 : index
    %c0_39 = arith.constant 0 : index
    %49 = vector.load %arg6[%c28, %c0_39] : memref<128x512xf32, #tpu.memory_space<vmem>>, vector<4x512xf32>
    tpu.vector_store %arg6[%c28, %c0_39], %48 {strides = array<i32>} : memref<128x512xf32, #tpu.memory_space<vmem>>, vector<4x512xf32>,
    %c0_40 = arith.constant 0 : index
    %c0_41 = arith.constant 0 : index
    %c18 = arith.constant 18 : index
    %50 = vector.load %arg1[%c0_40, %c0_41, %c18] : memref<1x4x658xf32, #tpu.memory_space<vmem>>, vector<1x4x512xf32>
    %51 = vector.shape_cast %50 : vector<1x4x512xf32> to vector<4x512xf32>
    %c8_42 = arith.constant 8 : index
    %c0_43 = arith.constant 0 : index
    %52 = vector.load %arg4[%c8_42, %c0_43] : memref<27x512xf32, #tpu.memory_space<vmem>>, vector<1x512xf32>
    %53 = vector.broadcast %52 : vector<1x512xf32> to vector<4x512xf32>
    %54 = arith.mulf %51, %53 : vector<4x512xf32>
    %c32 = arith.constant 32 : index
    %c0_44 = arith.constant 0 : index
    %55 = vector.load %arg6[%c32, %c0_44] : memref<128x512xf32, #tpu.memory_space<vmem>>, vector<4x512xf32>
    tpu.vector_store %arg6[%c32, %c0_44], %54 {strides = array<i32>} : memref<128x512xf32, #tpu.memory_space<vmem>>, vector<4x512xf32>,
    %c0_45 = arith.constant 0 : index
    %c0_46 = arith.constant 0 : index
    %c64 = arith.constant 64 : index
    %56 = vector.load %arg1[%c0_45, %c0_46, %c64] : memref<1x4x658xf32, #tpu.memory_space<vmem>>, vector<1x4x512xf32>
    %57 = vector.shape_cast %56 : vector<1x4x512xf32> to vector<4x512xf32>
    %c9_47 = arith.constant 9 : index
    %c0_48 = arith.constant 0 : index
    %58 = vector.load %arg4[%c9_47, %c0_48] : memref<27x512xf32, #tpu.memory_space<vmem>>, vector<1x512xf32>
    %59 = vector.broadcast %58 : vector<1x512xf32> to vector<4x512xf32>
    %60 = arith.mulf %57, %59 : vector<4x512xf32>
    %c36 = arith.constant 36 : index
    %c0_49 = arith.constant 0 : index
    %61 = vector.load %arg6[%c36, %c0_49] : memref<128x512xf32, #tpu.memory_space<vmem>>, vector<4x512xf32>
    tpu.vector_store %arg6[%c36, %c0_49], %60 {strides = array<i32>} : memref<128x512xf32, #tpu.memory_space<vmem>>, vector<4x512xf32>,
    %c0_50 = arith.constant 0 : index
    %c0_51 = arith.constant 0 : index
    %c65 = arith.constant 65 : index
    %62 = vector.load %arg1[%c0_50, %c0_51, %c65] : memref<1x4x658xf32, #tpu.memory_space<vmem>>, vector<1x4x512xf32>
    %63 = vector.shape_cast %62 : vector<1x4x512xf32> to vector<4x512xf32>
    %c10_52 = arith.constant 10 : index
    %c0_53 = arith.constant 0 : index
    %64 = vector.load %arg4[%c10_52, %c0_53] : memref<27x512xf32, #tpu.memory_space<vmem>>, vector<1x512xf32>
    %65 = vector.broadcast %64 : vector<1x512xf32> to vector<4x512xf32>
    %66 = arith.mulf %63, %65 : vector<4x512xf32>
    %c40 = arith.constant 40 : index
    %c0_54 = arith.constant 0 : index
    %67 = vector.load %arg6[%c40, %c0_54] : memref<128x512xf32, #tpu.memory_space<vmem>>, vector<4x512xf32>
    tpu.vector_store %arg6[%c40, %c0_54], %66 {strides = array<i32>} : memref<128x512xf32, #tpu.memory_space<vmem>>, vector<4x512xf32>,
    %c0_55 = arith.constant 0 : index
    %c0_56 = arith.constant 0 : index
    %c66 = arith.constant 66 : index
    %68 = vector.load %arg1[%c0_55, %c0_56, %c66] : memref<1x4x658xf32, #tpu.memory_space<vmem>>, vector<1x4x512xf32>
    %69 = vector.shape_cast %68 : vector<1x4x512xf32> to vector<4x512xf32>
    %c11 = arith.constant 11 : index
    %c0_57 = arith.constant 0 : index
    %70 = vector.load %arg4[%c11, %c0_57] : memref<27x512xf32, #tpu.memory_space<vmem>>, vector<1x512xf32>
    %71 = vector.broadcast %70 : vector<1x512xf32> to vector<4x512xf32>
    %72 = arith.mulf %69, %71 : vector<4x512xf32>
    %c44 = arith.constant 44 : index
    %c0_58 = arith.constant 0 : index
    %73 = vector.load %arg6[%c44, %c0_58] : memref<128x512xf32, #tpu.memory_space<vmem>>, vector<4x512xf32>
    tpu.vector_store %arg6[%c44, %c0_58], %72 {strides = array<i32>} : memref<128x512xf32, #tpu.memory_space<vmem>>, vector<4x512xf32>,
    %c0_59 = arith.constant 0 : index
    %c0_60 = arith.constant 0 : index
    %c72 = arith.constant 72 : index
    %74 = vector.load %arg1[%c0_59, %c0_60, %c72] : memref<1x4x658xf32, #tpu.memory_space<vmem>>, vector<1x4x512xf32>
    %75 = vector.shape_cast %74 : vector<1x4x512xf32> to vector<4x512xf32>
    %c12_61 = arith.constant 12 : index
    %c0_62 = arith.constant 0 : index
    %76 = vector.load %arg4[%c12_61, %c0_62] : memref<27x512xf32, #tpu.memory_space<vmem>>, vector<1x512xf32>
    %77 = vector.broadcast %76 : vector<1x512xf32> to vector<4x512xf32>
    %78 = arith.mulf %75, %77 : vector<4x512xf32>
    %c48 = arith.constant 48 : index
    %c0_63 = arith.constant 0 : index
    %79 = vector.load %arg6[%c48, %c0_63] : memref<128x512xf32, #tpu.memory_space<vmem>>, vector<4x512xf32>
    tpu.vector_store %arg6[%c48, %c0_63], %78 {strides = array<i32>} : memref<128x512xf32, #tpu.memory_space<vmem>>, vector<4x512xf32>,
    %c0_64 = arith.constant 0 : index
    %c0_65 = arith.constant 0 : index
    %c73 = arith.constant 73 : index
    %80 = vector.load %arg1[%c0_64, %c0_65, %c73] : memref<1x4x658xf32, #tpu.memory_space<vmem>>, vector<1x4x512xf32>
    %81 = vector.shape_cast %80 : vector<1x4x512xf32> to vector<4x512xf32>
    %c13 = arith.constant 13 : index
    %c0_66 = arith.constant 0 : index
    %82 = vector.load %arg4[%c13, %c0_66] : memref<27x512xf32, #tpu.memory_space<vmem>>, vector<1x512xf32>
    %83 = vector.broadcast %82 : vector<1x512xf32> to vector<4x512xf32>
    %84 = arith.mulf %81, %83 : vector<4x512xf32>
    %c52 = arith.constant 52 : index
    %c0_67 = arith.constant 0 : index
    %85 = vector.load %arg6[%c52, %c0_67] : memref<128x512xf32, #tpu.memory_space<vmem>>, vector<4x512xf32>
    tpu.vector_store %arg6[%c52, %c0_67], %84 {strides = array<i32>} : memref<128x512xf32, #tpu.memory_space<vmem>>, vector<4x512xf32>,
    %c0_68 = arith.constant 0 : index
    %c0_69 = arith.constant 0 : index
    %c74 = arith.constant 74 : index
    %86 = vector.load %arg1[%c0_68, %c0_69, %c74] : memref<1x4x658xf32, #tpu.memory_space<vmem>>, vector<1x4x512xf32>
    %87 = vector.shape_cast %86 : vector<1x4x512xf32> to vector<4x512xf32>
    %c14 = arith.constant 14 : index
    %c0_70 = arith.constant 0 : index
    %88 = vector.load %arg4[%c14, %c0_70] : memref<27x512xf32, #tpu.memory_space<vmem>>, vector<1x512xf32>
    %89 = vector.broadcast %88 : vector<1x512xf32> to vector<4x512xf32>
    %90 = arith.mulf %87, %89 : vector<4x512xf32>
    %c56 = arith.constant 56 : index
    %c0_71 = arith.constant 0 : index
    %91 = vector.load %arg6[%c56, %c0_71] : memref<128x512xf32, #tpu.memory_space<vmem>>, vector<4x512xf32>
    tpu.vector_store %arg6[%c56, %c0_71], %90 {strides = array<i32>} : memref<128x512xf32, #tpu.memory_space<vmem>>, vector<4x512xf32>,
    %c0_72 = arith.constant 0 : index
    %c0_73 = arith.constant 0 : index
    %c80 = arith.constant 80 : index
    %92 = vector.load %arg1[%c0_72, %c0_73, %c80] : memref<1x4x658xf32, #tpu.memory_space<vmem>>, vector<1x4x512xf32>
    %93 = vector.shape_cast %92 : vector<1x4x512xf32> to vector<4x512xf32>
    %c15 = arith.constant 15 : index
    %c0_74 = arith.constant 0 : index
    %94 = vector.load %arg4[%c15, %c0_74] : memref<27x512xf32, #tpu.memory_space<vmem>>, vector<1x512xf32>
    %95 = vector.broadcast %94 : vector<1x512xf32> to vector<4x512xf32>
    %96 = arith.mulf %93, %95 : vector<4x512xf32>
    %c60 = arith.constant 60 : index
    %c0_75 = arith.constant 0 : index
    %97 = vector.load %arg6[%c60, %c0_75] : memref<128x512xf32, #tpu.memory_space<vmem>>, vector<4x512xf32>
    tpu.vector_store %arg6[%c60, %c0_75], %96 {strides = array<i32>} : memref<128x512xf32, #tpu.memory_space<vmem>>, vector<4x512xf32>,
    %c0_76 = arith.constant 0 : index
    %c0_77 = arith.constant 0 : index
    %c81 = arith.constant 81 : index
    %98 = vector.load %arg1[%c0_76, %c0_77, %c81] : memref<1x4x658xf32, #tpu.memory_space<vmem>>, vector<1x4x512xf32>
    %99 = vector.shape_cast %98 : vector<1x4x512xf32> to vector<4x512xf32>
    %c16_78 = arith.constant 16 : index
    %c0_79 = arith.constant 0 : index
    %100 = vector.load %arg4[%c16_78, %c0_79] : memref<27x512xf32, #tpu.memory_space<vmem>>, vector<1x512xf32>
    %101 = vector.broadcast %100 : vector<1x512xf32> to vector<4x512xf32>
    %102 = arith.mulf %99, %101 : vector<4x512xf32>
    %c64_80 = arith.constant 64 : index
    %c0_81 = arith.constant 0 : index
    %103 = vector.load %arg6[%c64_80, %c0_81] : memref<128x512xf32, #tpu.memory_space<vmem>>, vector<4x512xf32>
    tpu.vector_store %arg6[%c64_80, %c0_81], %102 {strides = array<i32>} : memref<128x512xf32, #tpu.memory_space<vmem>>, vector<4x512xf32>,
    %c0_82 = arith.constant 0 : index
    %c0_83 = arith.constant 0 : index
    %c82 = arith.constant 82 : index
    %104 = vector.load %arg1[%c0_82, %c0_83, %c82] : memref<1x4x658xf32, #tpu.memory_space<vmem>>, vector<1x4x512xf32>
    %105 = vector.shape_cast %104 : vector<1x4x512xf32> to vector<4x512xf32>
    %c17_84 = arith.constant 17 : index
    %c0_85 = arith.constant 0 : index
    %106 = vector.load %arg4[%c17_84, %c0_85] : memref<27x512xf32, #tpu.memory_space<vmem>>, vector<1x512xf32>
    %107 = vector.broadcast %106 : vector<1x512xf32> to vector<4x512xf32>
    %108 = arith.mulf %105, %107 : vector<4x512xf32>
    %c68 = arith.constant 68 : index
    %c0_86 = arith.constant 0 : index
    %109 = vector.load %arg6[%c68, %c0_86] : memref<128x512xf32, #tpu.memory_space<vmem>>, vector<4x512xf32>
    tpu.vector_store %arg6[%c68, %c0_86], %108 {strides = array<i32>} : memref<128x512xf32, #tpu.memory_space<vmem>>, vector<4x512xf32>,
    %c0_87 = arith.constant 0 : index
    %c0_88 = arith.constant 0 : index
    %c128 = arith.constant 128 : index
    %110 = vector.load %arg1[%c0_87, %c0_88, %c128] : memref<1x4x658xf32, #tpu.memory_space<vmem>>, vector<1x4x512xf32>
    %111 = vector.shape_cast %110 : vector<1x4x512xf32> to vector<4x512xf32>
    %c18_89 = arith.constant 18 : index
    %c0_90 = arith.constant 0 : index
    %112 = vector.load %arg4[%c18_89, %c0_90] : memref<27x512xf32, #tpu.memory_space<vmem>>, vector<1x512xf32>
    %113 = vector.broadcast %112 : vector<1x512xf32> to vector<4x512xf32>
    %114 = arith.mulf %111, %113 : vector<4x512xf32>
    %c72_91 = arith.constant 72 : index
    %c0_92 = arith.constant 0 : index
    %115 = vector.load %arg6[%c72_91, %c0_92] : memref<128x512xf32, #tpu.memory_space<vmem>>, vector<4x512xf32>
    tpu.vector_store %arg6[%c72_91, %c0_92], %114 {strides = array<i32>} : memref<128x512xf32, #tpu.memory_space<vmem>>, vector<4x512xf32>,
    %c0_93 = arith.constant 0 : index
    %c0_94 = arith.constant 0 : index
    %c129 = arith.constant 129 : index
    %116 = vector.load %arg1[%c0_93, %c0_94, %c129] : memref<1x4x658xf32, #tpu.memory_space<vmem>>, vector<1x4x512xf32>
    %117 = vector.shape_cast %116 : vector<1x4x512xf32> to vector<4x512xf32>
    %c19 = arith.constant 19 : index
    %c0_95 = arith.constant 0 : index
    %118 = vector.load %arg4[%c19, %c0_95] : memref<27x512xf32, #tpu.memory_space<vmem>>, vector<1x512xf32>
    %119 = vector.broadcast %118 : vector<1x512xf32> to vector<4x512xf32>
    %120 = arith.mulf %117, %119 : vector<4x512xf32>
    %c76 = arith.constant 76 : index
    %c0_96 = arith.constant 0 : index
    %121 = vector.load %arg6[%c76, %c0_96] : memref<128x512xf32, #tpu.memory_space<vmem>>, vector<4x512xf32>
    tpu.vector_store %arg6[%c76, %c0_96], %120 {strides = array<i32>} : memref<128x512xf32, #tpu.memory_space<vmem>>, vector<4x512xf32>,
    %c0_97 = arith.constant 0 : index
    %c0_98 = arith.constant 0 : index
    %c130 = arith.constant 130 : index
    %122 = vector.load %arg1[%c0_97, %c0_98, %c130] : memref<1x4x658xf32, #tpu.memory_space<vmem>>, vector<1x4x512xf32>
    %123 = vector.shape_cast %122 : vector<1x4x512xf32> to vector<4x512xf32>
    %c20_99 = arith.constant 20 : index
    %c0_100 = arith.constant 0 : index
    %124 = vector.load %arg4[%c20_99, %c0_100] : memref<27x512xf32, #tpu.memory_space<vmem>>, vector<1x512xf32>
    %125 = vector.broadcast %124 : vector<1x512xf32> to vector<4x512xf32>
    %126 = arith.mulf %123, %125 : vector<4x512xf32>
    %c80_101 = arith.constant 80 : index
    %c0_102 = arith.constant 0 : index
    %127 = vector.load %arg6[%c80_101, %c0_102] : memref<128x512xf32, #tpu.memory_space<vmem>>, vector<4x512xf32>
    tpu.vector_store %arg6[%c80_101, %c0_102], %126 {strides = array<i32>} : memref<128x512xf32, #tpu.memory_space<vmem>>, vector<4x512xf32>,
    %c0_103 = arith.constant 0 : index
    %c0_104 = arith.constant 0 : index
    %c136 = arith.constant 136 : index
    %128 = vector.load %arg1[%c0_103, %c0_104, %c136] : memref<1x4x658xf32, #tpu.memory_space<vmem>>, vector<1x4x512xf32>
    %129 = vector.shape_cast %128 : vector<1x4x512xf32> to vector<4x512xf32>
    %c21 = arith.constant 21 : index
    %c0_105 = arith.constant 0 : index
    %130 = vector.load %arg4[%c21, %c0_105] : memref<27x512xf32, #tpu.memory_space<vmem>>, vector<1x512xf32>
    %131 = vector.broadcast %130 : vector<1x512xf32> to vector<4x512xf32>
    %132 = arith.mulf %129, %131 : vector<4x512xf32>
    %c84 = arith.constant 84 : index
    %c0_106 = arith.constant 0 : index
    %133 = vector.load %arg6[%c84, %c0_106] : memref<128x512xf32, #tpu.memory_space<vmem>>, vector<4x512xf32>
    tpu.vector_store %arg6[%c84, %c0_106], %132 {strides = array<i32>} : memref<128x512xf32, #tpu.memory_space<vmem>>, vector<4x512xf32>,
    %c0_107 = arith.constant 0 : index
    %c0_108 = arith.constant 0 : index
    %c137 = arith.constant 137 : index
    %134 = vector.load %arg1[%c0_107, %c0_108, %c137] : memref<1x4x658xf32, #tpu.memory_space<vmem>>, vector<1x4x512xf32>
    %135 = vector.shape_cast %134 : vector<1x4x512xf32> to vector<4x512xf32>
    %c22 = arith.constant 22 : index
    %c0_109 = arith.constant 0 : index
    %136 = vector.load %arg4[%c22, %c0_109] : memref<27x512xf32, #tpu.memory_space<vmem>>, vector<1x512xf32>
    %137 = vector.broadcast %136 : vector<1x512xf32> to vector<4x512xf32>
    %138 = arith.mulf %135, %137 : vector<4x512xf32>
    %c88 = arith.constant 88 : index
    %c0_110 = arith.constant 0 : index
    %139 = vector.load %arg6[%c88, %c0_110] : memref<128x512xf32, #tpu.memory_space<vmem>>, vector<4x512xf32>
    tpu.vector_store %arg6[%c88, %c0_110], %138 {strides = array<i32>} : memref<128x512xf32, #tpu.memory_space<vmem>>, vector<4x512xf32>,
    %c0_111 = arith.constant 0 : index
    %c0_112 = arith.constant 0 : index
    %c138 = arith.constant 138 : index
    %140 = vector.load %arg1[%c0_111, %c0_112, %c138] : memref<1x4x658xf32, #tpu.memory_space<vmem>>, vector<1x4x512xf32>
    %141 = vector.shape_cast %140 : vector<1x4x512xf32> to vector<4x512xf32>
    %c23 = arith.constant 23 : index
    %c0_113 = arith.constant 0 : index
    %142 = vector.load %arg4[%c23, %c0_113] : memref<27x512xf32, #tpu.memory_space<vmem>>, vector<1x512xf32>
    %143 = vector.broadcast %142 : vector<1x512xf32> to vector<4x512xf32>
    %144 = arith.mulf %141, %143 : vector<4x512xf32>
    %c92 = arith.constant 92 : index
    %c0_114 = arith.constant 0 : index
    %145 = vector.load %arg6[%c92, %c0_114] : memref<128x512xf32, #tpu.memory_space<vmem>>, vector<4x512xf32>
    tpu.vector_store %arg6[%c92, %c0_114], %144 {strides = array<i32>} : memref<128x512xf32, #tpu.memory_space<vmem>>, vector<4x512xf32>,
    %c0_115 = arith.constant 0 : index
    %c0_116 = arith.constant 0 : index
    %c144 = arith.constant 144 : index
    %146 = vector.load %arg1[%c0_115, %c0_116, %c144] : memref<1x4x658xf32, #tpu.memory_space<vmem>>, vector<1x4x512xf32>
    %147 = vector.shape_cast %146 : vector<1x4x512xf32> to vector<4x512xf32>
    %c24_117 = arith.constant 24 : index
    %c0_118 = arith.constant 0 : index
    %148 = vector.load %arg4[%c24_117, %c0_118] : memref<27x512xf32, #tpu.memory_space<vmem>>, vector<1x512xf32>
    %149 = vector.broadcast %148 : vector<1x512xf32> to vector<4x512xf32>
    %150 = arith.mulf %147, %149 : vector<4x512xf32>
    %c96 = arith.constant 96 : index
    %c0_119 = arith.constant 0 : index
    %151 = vector.load %arg6[%c96, %c0_119] : memref<128x512xf32, #tpu.memory_space<vmem>>, vector<4x512xf32>
    tpu.vector_store %arg6[%c96, %c0_119], %150 {strides = array<i32>} : memref<128x512xf32, #tpu.memory_space<vmem>>, vector<4x512xf32>,
    %c0_120 = arith.constant 0 : index
    %c0_121 = arith.constant 0 : index
    %c145 = arith.constant 145 : index
    %152 = vector.load %arg1[%c0_120, %c0_121, %c145] : memref<1x4x658xf32, #tpu.memory_space<vmem>>, vector<1x4x512xf32>
    %153 = vector.shape_cast %152 : vector<1x4x512xf32> to vector<4x512xf32>
    %c25 = arith.constant 25 : index
    %c0_122 = arith.constant 0 : index
    %154 = vector.load %arg4[%c25, %c0_122] : memref<27x512xf32, #tpu.memory_space<vmem>>, vector<1x512xf32>
    %155 = vector.broadcast %154 : vector<1x512xf32> to vector<4x512xf32>
    %156 = arith.mulf %153, %155 : vector<4x512xf32>
    %c100 = arith.constant 100 : index
    %c0_123 = arith.constant 0 : index
    %157 = vector.load %arg6[%c100, %c0_123] : memref<128x512xf32, #tpu.memory_space<vmem>>, vector<4x512xf32>
    tpu.vector_store %arg6[%c100, %c0_123], %156 {strides = array<i32>} : memref<128x512xf32, #tpu.memory_space<vmem>>, vector<4x512xf32>,
    %c0_124 = arith.constant 0 : index
    %c0_125 = arith.constant 0 : index
    %c146 = arith.constant 146 : index
    %158 = vector.load %arg1[%c0_124, %c0_125, %c146] : memref<1x4x658xf32, #tpu.memory_space<vmem>>, vector<1x4x512xf32>
    %159 = vector.shape_cast %158 : vector<1x4x512xf32> to vector<4x512xf32>
    %c26 = arith.constant 26 : index
    %c0_126 = arith.constant 0 : index
    %160 = vector.load %arg4[%c26, %c0_126] : memref<27x512xf32, #tpu.memory_space<vmem>>, vector<1x512xf32>
    %161 = vector.broadcast %160 : vector<1x512xf32> to vector<4x512xf32>
    %162 = arith.mulf %159, %161 : vector<4x512xf32>
    %c104_127 = arith.constant 104 : index
    %c0_128 = arith.constant 0 : index
    %163 = vector.load %arg6[%c104_127, %c0_128] : memref<128x512xf32, #tpu.memory_space<vmem>>, vector<4x512xf32>
    tpu.vector_store %arg6[%c104_127, %c0_128], %162 {strides = array<i32>} : memref<128x512xf32, #tpu.memory_space<vmem>>, vector<4x512xf32>,
    %c0_129 = arith.constant 0 : index
    %c0_130 = arith.constant 0 : index
    %164 = vector.load %arg2[%c0_129, %c0_130] : memref<8x128xf32, #tpu.memory_space<vmem>>, vector<8x128xf32>
    %c0_131 = arith.constant 0 : index
    %c0_132 = arith.constant 0 : index
    %165 = vector.load %arg6[%c0_131, %c0_132] : memref<128x512xf32, #tpu.memory_space<vmem>>, vector<128x512xf32>
    %cst_133 = arith.constant dense<0.000000e+00> : vector<8x512xf32>
    %166 = tpu.matmul %164, %165, %cst_133 {dimension_numbers = #tpu.dot_dimension_numbers<[1], [0], [0], [1], [0, 0, 1, 1], [], []>} : vector<8x128xf32>, vector<128x512xf32>, vector<8x512xf32> -> vector<8x512xf32>
    %c0_134 = arith.constant 0 : index
    %c0_135 = arith.constant 0 : index
    %167 = vector.load %arg3[%c0_134, %c0_135] : memref<8x1xf32, #tpu.memory_space<vmem>>, vector<8x1xf32>
    %168 = vector.broadcast %167 : vector<8x1xf32> to vector<8x512xf32>
    %169 = arith.addf %166, %168 : vector<8x512xf32>
    %cst_136 = arith.constant 0.000000e+00 : f32
    %170 = vector.broadcast %cst_136 : f32 to vector<8x512xf32>
    %171 = arith.maximumf %169, %170 : vector<8x512xf32>
    %c0_137 = arith.constant 0 : index
    %c0_138 = arith.constant 0 : index
    %c0_139 = arith.constant 0 : index
    %172 = vector.load %arg5[%c0_137, %c0_138, %c0_139] : memref<1x8x512xf32, #tpu.memory_space<vmem>>, vector<1x8x512xf32>
    %173 = vector.shape_cast %172 : vector<1x8x512xf32> to vector<8x512xf32>
    %174 = vector.shape_cast %171 : vector<8x512xf32> to vector<1x8x512xf32>
    tpu.vector_store %arg5[%c0_137, %c0_138, %c0_139], %174 {strides = array<i32>} : memref<1x8x512xf32, #tpu.memory_space<vmem>>, vector<1x8x512xf32>,
    return
  }
  func.func @transform_0(%arg0: i32) -> (i32, i32, i32) {
    %c0_i32 = arith.constant 0 : i32
    %c0_i32_0 = arith.constant 0 : i32
    %c0_i32_1 = arith.constant 0 : i32
    return %arg0, %c0_i32, %c0_i32_0 : i32, i32, i32
  }
  func.func @transform_1(%arg0: i32) -> (i32, i32) {
    %c0_i32 = arith.constant 0 : i32
    %c0_i32_0 = arith.constant 0 : i32
    %c0_i32_1 = arith.constant 0 : i32
    return %c0_i32, %c0_i32_0 : i32, i32
  }
  func.func @transform_2(%arg0: i32) -> (i32, i32) {
    %c0_i32 = arith.constant 0 : i32
    %c0_i32_0 = arith.constant 0 : i32
    %c0_i32_1 = arith.constant 0 : i32
    return %c0_i32, %c0_i32_0 : i32, i32
  }
  func.func @transform_3(%arg0: i32) -> (i32, i32) {
    %c0_i32 = arith.constant 0 : i32
    %c0_i32_0 = arith.constant 0 : i32
    %c0_i32_1 = arith.constant 0 : i32
    return %c0_i32, %c0_i32_0 : i32, i32
  }
  func.func @transform_4(%arg0: i32) -> (i32, i32, i32) {
    %c0_i32 = arith.constant 0 : i32
    %c0_i32_0 = arith.constant 0 : i32
    %c0_i32_1 = arith.constant 0 : i32
    return %arg0, %c0_i32, %c0_i32_0 : i32, i32, i32
  }
}

</mosaic_0001>

<bundles_post_ra>
// kernel: tpu_custom_call.1
= control target key start
LH: loop header
LB: loop body
LE: loop exit
PB: predicated region body
PF: predicated region fallthrough
CT: control target
= control target key end

     0   :  { %9 = vsyncpa [#allocation4], 0  ;;  %s3749_s0 = inlined_call_operand.hbm [shape: f32[2,4,658], index: 0, kind: input, shape index: {}]   ;;  %s3750_s1 = inlined_call_operand.vmem [shape: f32[8,128], index: 1, kind: input, shape index: {}]   ;;  %s3751_s2 = inlined_call_operand.vmem [shape: f32[8,1], index: 2, kind: input, shape index: {}]   ;;  %s3752_s3 = inlined_call_operand.hbm [shape: f32[27,512], index: 3, kind: input, shape index: {}]   ;;  %s3753_s4 = inlined_call_operand.hbm [shape: f32[2,8,512], index: 4, kind: output, shape index: {}]  }
   0x1   :  { %11 = vsyncpa [#allocation4 + $0x1], 0 }
   0x2   :  { %12 = vsyncpa [#allocation7], 0 }
   0x3   :  { %13 = vsyncpa [#allocation5], 0 }
   0x4   :  { %15 = vsyncpa [#allocation5 + $0x1], 0  ;;  %s2700_s15 = smov 0   ;;  %s2702_s16 = smov 0  }
   0x5   :  { %s2704_s17 = smov 0   ;;  %s2706_s18 = smov 0  }
   0x6 LB: > { %s2721_s19 = sadd.s32 4294967295, %s2632_s18   ;;  %s2327_s20 = sadd.s32 4294967294, %s2632_s18   ;;  %s2632_s18 = sphi %s2706_s18, %s3773_s18   ;;  %s2628_s17 = sphi %s2704_s17, %s3772_s17   ;;  %s2624_s16 = sphi %s2702_s16, %s3771_s16   ;;  %s2620_s15 = sphi %s2700_s15, %s3770_s15  }
   0x7   : > { %p41_p0 = scmp.ne.s32.totalorder %s2624_s16, %s2620_s15  ;;  %p3754_p1 = scmp.eq.s32.totalorder %s2721_s19, 0 }
   0x8   : > { %p134_p3 = scmp.eq.s32.totalorder %s2327_s20, 1  ;;  %p2328_p5 = scmp.ge.s32.totalorder %s2632_s18, 1 }
   0x9   : > { %p2730_p4 = por %p3754_p1, %p41_p0  ;;  %p141_p7 = scmp.lt.s32.totalorder %s2632_s18, 3 }
   0xa   : > { %p2735_p6 = por %p134_p3, %p41_p0  ;;  %s2634_s24 = smov [#allocation6]  }
   0xb   : > { %s3757_s21 = scalar_select %p2730_p4, 1, 0 }
   0xc   : > { %s3758_s22 = scalar_select %p2735_p6, 1, 0 }
   0xd   : > { %p2740_p8 = pnand %p2328_p5, %p141_p7  ;;  %s159_s25 = sshll.u32 %s2634_s24, 4  ;;  %s2744_s25 = int_to_ptr.vmem [resolvable:$true] %s159_s25 }
   0xe   : > { %s2756_s27 = sadd.s32 1, %s2632_s18   ;;  %s28_s28 = sadd.s32 1, %s2628_s17 }
   0xf   : > { %s3759_s23 = scalar_select %p2740_p8, 1, 0 }
  0x10   : > { %p2416_p9 = pneg %p2740_p8  ;;  %s25_s29 = ssub.s32 %s2632_s18, %s2756_s27 }
  0x11   : > { %s2504_s6 = scalar_lea.hbm %s3752_s3, 2048 }
  0x12   : > { %p2751_p11 = pnand %p2416_p9, %p3754_p1  ;;  %p2505_p12 = scmp.ne.s32.totalorder %s3752_s3, %s2504_s6 }
  0x13   : > { %p2511_p5 = scmp.lt.u32.totalorder %s2504_s6, %s3752_s3 }
  0x14   : > { %p2506_p13 = pneg %p2751_p11 }
  0x16   : > { %p2507_p0 = pnand %p2506_p13, %p2505_p12 }
  0x18   : > { %p2508_p3 = pneg %p2507_p0 }
  0x1a   : > { %p2513_p7 = pnand %p2511_p5, %p2508_p3 }
  0x1c   : > { %2516 = shalt.err (!%p2513_p7)
}
  0x1d   : > { %s2517_s11 = scalar_lea.vmem %s2744_s25, 2048  ;;  %p2525_p2 = scmp.lt.s32.totalorder %s2744_s25, %s2744_s25 }
  0x1e   : > { %p2518_p9 = scmp.ne.s32.totalorder %s2744_s25, %s2517_s11  ;;  %p2526_p6 = scmp.lt.s32.totalorder %s2517_s11, %s2517_s11 }
  0x20   : > { %p2520_p10 = pnand %p2518_p9, %p2506_p13  ;;  %p2527_p4 = por %p2526_p6, %p2525_p2 }
  0x22   : > { %p2521_p1 = pneg %p2520_p10 }
  0x24   : > { %p2528_p8 = pnand %p2527_p4, %p2521_p1 }
  0x26   : > { %2531 = shalt.err (!%p2528_p8)
}
  0x27   : > { %s2635_s12 = smov 512   ;;  %s2636_s13 = smov 32  }
  0x28   : > { %2419 = dma.hbm_to_vmem [thread:$0]  (!%p2751_p11), %s3752_s3, 2048, %s2744_s25, [#allocation7], %s2635_s12, %s2635_s12, %s2636_s13  }
  0x29   : > { %p26_p2 = scmp.eq.s32.totalorder %s25_s29, 0  ;;  %p35_p1 = scmp.ne.s32.totalorder %s2628_s17, %s2624_s16 }
  0x2a   : > { %p36_p4 = scmp.eq.s32.totalorder %s2632_s18, 0  ;;  %p2429_p6 = scmp.lt.s32.totalorder %s2632_s18, 2 }
  0x2b   : > { %s2787_s24 = scalar_select %p26_p2, %s2628_s17, %s28_s28  }
  0x2c   : > { %p37_p8 = por %p36_p4, %p35_p1  ;;  %p3761_p10 = scmp.eq.s32.totalorder %s2721_s19, 1 }
  0x2d   : > { %s173_s5 = sand.u32 1, %s2628_s17   ;;  %s2406_s6 = smul.u32 384, %s2632_s18 }
  0x2e   : > { %p2791_p12 = por %p3761_p10, %p35_p1  ;;  %s2405_s7 = smul.u32 24, %s173_s5 }
  0x2f   : > { %p2797_p13 = pnand %p2429_p6, %p37_p8  ;;  %s2804_s28 = scalar_lea.hbm %s3749_s0, %s2406_s6 }
  0x30   : > { %s177_s8 = scalar_lea.vmem [#allocation3], %s2405_s7  ;;  %s174_s10 = scalar_lea.sflag [#allocation4], %s173_s5 }
  0x31   : > { %s185_s9 = sshll.u32 %s177_s8, 4  ;;  %s2532_s11 = scalar_lea.hbm %s2804_s28, 384  ;;  %s2806_s9 = int_to_ptr.vmem [resolvable:$true] %s185_s9 }
  0x32   : > { %p2533_p11 = scmp.ne.s32.totalorder %s2804_s28, %s2532_s11  ;;  %p2534_p0 = pneg %p2797_p13 }
  0x33   : > { %s2537_s14 = scalar_lea.hbm %s3749_s0, 768  ;;  %p2538_p7 = scmp.lt.u32.totalorder %s2804_s28, %s3749_s0 }
  0x34   : > { %p2535_p3 = pnand %p2534_p0, %p2533_p11  ;;  %p2539_p9 = scmp.lt.u32.totalorder %s2537_s14, %s2532_s11 }
  0x35   : > { %p2541_p1 = scmp.lt.u32.totalorder %s2532_s11, %s2804_s28 }
  0x36   : > { %p2536_p5 = pneg %p2535_p3  ;;  %p2540_p2 = por %p2539_p9, %p2538_p7 }
  0x38   : > { %p2542_p4 = por %p2541_p1, %p2540_p2 }
  0x3a   : > { %p2543_p6 = pnand %p2542_p4, %p2536_p5 }
  0x3c   : > { %2546 = shalt.err (!%p2543_p6)
}
  0x3d   : > { %s2547_s5 = scalar_lea.vmem %s2806_s9, 384  ;;  %s2637_s7 = smov [#allocation3]  }
  0x3e   : > { %p2548_p8 = scmp.ne.s32.totalorder %s2806_s9, %s2547_s5  ;;  %s2552_s25 = sshll.u32 %s2637_s7, 4  ;;  %s2553_s25 = int_to_ptr.vmem [resolvable:$false] %s2552_s25 }
  0x3f   : > { %s2554_s29 = scalar_lea.vmem %s2553_s25, 768  ;;  %p2555_p3 = scmp.lt.s32.totalorder %s2806_s9, %s2553_s25 }
  0x40   : > { %p2550_p10 = pnand %p2548_p8, %p2534_p0  ;;  %p2556_p7 = scmp.lt.s32.totalorder %s2554_s29, %s2547_s5 }
  0x42   : > { %p2551_p11 = pneg %p2550_p10  ;;  %p2557_p9 = por %p2556_p7, %p2555_p3 }
  0x44   : > { %p2558_p2 = pnand %p2557_p9, %p2551_p11 }
  0x46   : > { %2561 = shalt.err (!%p2558_p2)
}
  0x47   : > { %2423 = dma.hbm_to_vmem [thread:$0]  (!%p2797_p13), %s2804_s28, 384, %s2806_s9, %s174_s10  }
  0x48   : > { %p3764_p5 = scmp.ne.s32.totalorder %s3759_s23, 0 }
  0x49   : > { %s2836_s8 = sand.u32 (!%p3764_p5), 1, %s2624_s16   ;;  %p3765_p0 = scmp.ne.s32.totalorder (!%p3764_p5), %s3757_s21, 0 }
  0x4a   : > { %194 = sbr.rel (%p3764_p5) target bundleno = 831 (0x33f), region = 36  ;;  %s197_s12 = scalar_lea.sflag (!%p3764_p5), [#allocation4], %s2836_s8 }
  0x4b   : > { %s2407_s11 = smul.u32 (!%p3764_p5), 24, %s2836_s8 }
  0x4d   : > { %s2840_s13 = scalar_lea.vmem (!%p3764_p5), [#allocation3], %s2407_s11 }
  0x51   : > { %2607 = dma.done.wait (%p3765_p0), %s197_s12, 384  }
  0x52   : > { %2609 = vsyncadd (%p3765_p0), %s197_s12, 4294966912  ;;  %p3766_p13 = scmp.eq.s32.totalorder %s2721_s19, 0 }
  0x54   : > { %2611 = dma.done.wait (%p3766_p13), [#allocation7], 2048   ;;  %p3767_p1 = pmov %p3766_p13 }
  0x55   : > { %v245_v0 = vlaneseq  ;;  %v351_v6 = vld [vmem:[#allocation6 + $0x2] ss:$8 sm:$0xf]  ;;  %v281_v7 = vld [vmem:[#allocation6 + $0x1] ss:$8 sm:$0xf] }
  0x56   : > { %2613 = vsyncadd (%p3767_p1), [#allocation7], 4294965248  ;;  %v419_v12 = vld [vmem:[#allocation6 + $0x3] ss:$8 sm:$0xf]  ;;  %s2638_s21 = smov 2  }
  0x57   : > { %v246_v1 = vshrl.u32 %v245_v0, 7  ;;  %s2639_s23 = smov 1   ;;  %v488_v25 = vld [vmem:[#allocation6 + $0x4] ss:$8 sm:$0xf]  ;;  %s2640_s26 = smov 8  }
  0x58   : > { %v556_v32 = vld [vmem:[#allocation6 + $0x5] ss:$8 sm:$0xf]  ;;  %v625_v39 = vld [vmem:[#allocation6 + $0x6] ss:$8 sm:$0xf] }
  0x59   : > { %v2850_v2 = vsub.s32 0, %v246_v1  ;;  %v2852_v3 = vsub.s32 1, %v246_v1  ;;  %v2854_v4 = vsub.s32 2, %v246_v1  ;;  %v2856_v5 = vsub.s32 3, %v246_v1  ;;  %s2641_s28 = smov 9   ;;  %s2642_s9 = smov 10  }
  0x5a   : > { %v693_v46 = vld [vmem:[#allocation6 + $0x7] ss:$8 sm:$0xf]  ;;  %v762_v53 = vld [vmem:[#allocation6 + $0x20] ss:$8 sm:$0xf] }
  0x5b   : > { %v356_v8 = vrot.slane %v351_v6, %v2850_v2  ;;  %v360_v9 = vrot.slane %v351_v6, %v2852_v3  ;;  %v286_v10 = vrot.slane %v281_v7, %v2850_v2  ;;  %v290_v11 = vrot.slane %v281_v7, %v2852_v3  ;;  %s2643_s10 = smov 16   ;;  %v830_v60 = vld [vmem:[#allocation6 + $0x21] ss:$8 sm:$0xf]  ;;  %s2644_s14 = smov 17  }
  0x5c   : > { %v364_v13 = vrot.slane %v351_v6, %v2854_v4  ;;  %v368_v14 = vrot.slane %v351_v6, %v2856_v5  ;;  %v294_v15 = vrot.slane %v281_v7, %v2854_v4  ;;  %v298_v16 = vrot.slane %v281_v7, %v2856_v5  ;;  %v898_v7 = vld [vmem:[#allocation6 + $0x22] ss:$8 sm:$0xf]  ;;  %s2645_s20 = smov 18   ;;  %s2646_s6 = smov 64  }
  0x5d   : > { %v369_v17 = vcombine.low %v356_v8, %v360_v9  ;;  %v299_v18 = vcombine.low %v286_v10, %v290_v11  ;;  %v432_v20 = vrot.slane %v419_v12, %v2854_v4  ;;  %v436_v21 = vrot.slane %v419_v12, %v2856_v5  ;;  %s2647_s5 = smov 65   ;;  %s2648_s7 = smov 66  }
  0x5e   : > { %v370_v19 = vcombine.low %v364_v13, %v368_v14  ;;  %v300_v22 = vcombine.low %v294_v15, %v298_v16  ;;  %v424_v23 = vrot.slane %v419_v12, %v2850_v2  ;;  %v428_v24 = vrot.slane %v419_v12, %v2852_v3  ;;  %v966_v14 = vld [vmem:[#allocation6 + $0x23] ss:$8 sm:$0xf]  ;;  %s2649_s25 = smov 72   ;;  %s2650_s29 = smov 73  }
  0x5f   : > { %371 = vrot.lane.b32.xlu1 %v369_v17, %s2638_s21  ;;  %301 = vrot.lane.b32.xlu0 %v299_v18, %s2639_s23  ;;  %v438_v26 = vcombine.low %v432_v20, %v436_v21  ;;  %v501_v27 = vrot.slane %v488_v25, %v2854_v4  ;;  %v505_v28 = vrot.slane %v488_v25, %v2856_v5  ;;  %v1035_v21 = vld [vmem:[#allocation6 + $0x24] ss:$8 sm:$0xf]  ;;  %s2651_s11 = smov 74   ;;  %s2652_s12 = smov 80   ;;  %vm307_vm0 = vcmask 7168  }
  0x60   : > { %v437_v29 = vcombine.low %v424_v23, %v428_v24  ;;  %v493_v30 = vrot.slane %v488_v25, %v2850_v2  ;;  %v497_v31 = vrot.slane %v488_v25, %v2852_v3  ;;  %v561_v34 = vrot.slane %v556_v32, %v2850_v2 }
  0x61   : > { %v507_v33 = vcombine.low %v501_v27, %v505_v28  ;;  %v565_v35 = vrot.slane %v556_v32, %v2852_v3  ;;  %v569_v37 = vrot.slane %v556_v32, %v2854_v4  ;;  %v573_v38 = vrot.slane %v556_v32, %v2856_v5  ;;  %v1103_v28 = vld [vmem:[#allocation6 + $0x25] ss:$8 sm:$0xf] }
  0x62   : > { %v506_v36 = vcombine.low %v493_v30, %v497_v31  ;;  %v630_v40 = vrot.slane %v625_v39, %v2850_v2  ;;  %v634_v41 = vrot.slane %v625_v39, %v2852_v3  ;;  %v638_v42 = vrot.slane %v625_v39, %v2854_v4 }
  0x63   : > { %373 = vrot.lane.b32.xlu1 %v370_v19, %s2638_s21  ;;  %303 = vrot.lane.b32.xlu0 %v300_v22, %s2639_s23  ;;  %v574_v43 = vcombine.low %v561_v34, %v565_v35  ;;  %v575_v44 = vcombine.low %v569_v37, %v573_v38  ;;  %v642_v45 = vrot.slane %v625_v39, %v2856_v5  ;;  %v1172_v35 = vld [vmem:[#allocation6 + $0x26] ss:$8 sm:$0xf]  ;;  %vm377_vm1 = vcmask 15360  }
  0x64   : > { %v643_v47 = vcombine.low %v630_v40, %v634_v41  ;;  %v698_v48 = vrot.slane %v693_v46, %v2850_v2  ;;  %v702_v49 = vrot.slane %v693_v46, %v2852_v3  ;;  %v706_v51 = vrot.slane %v693_v46, %v2854_v4 }
  0x65   : > { %v644_v50 = vcombine.low %v638_v42, %v642_v45  ;;  %v710_v52 = vrot.slane %v693_v46, %v2856_v5  ;;  %v767_v55 = vrot.slane %v762_v53, %v2850_v2  ;;  %v771_v56 = vrot.slane %v762_v53, %v2852_v3  ;;  %v1240_v42 = vld [vmem:[#allocation6 + $0x27] ss:$8 sm:$0xf] }
  0x66   : > { %v711_v54 = vcombine.low %v698_v48, %v702_v49  ;;  %v775_v58 = vrot.slane %v762_v53, %v2854_v4  ;;  %v779_v59 = vrot.slane %v762_v53, %v2856_v5  ;;  %v835_v62 = vrot.slane %v830_v60, %v2850_v2  ;;  %v1309_v49 = vld [vmem:[#allocation6 + $0x40] ss:$8 sm:$0xf] }
  0x67   : > { %441 = vrot.lane.b32.xlu1 %v438_v26, %s2640_s26  ;;  %439 = vrot.lane.b32.xlu0 %v437_v29, %s2640_s26  ;;  %v712_v57 = vcombine.low %v706_v51, %v710_v52  ;;  %v780_v61 = vcombine.low %v767_v55, %v771_v56  ;;  %v839_v63 = vrot.slane %v830_v60, %v2852_v3  ;;  %v1377_v56 = vld [vmem:[#allocation6 + $0x41] ss:$8 sm:$0xf]  ;;  %vm309_vm2 = vcmask 1043456  }
  0x68   : > { %v781_v0 = vcombine.low %v775_v58, %v779_v59  ;;  %v843_v1 = vrot.slane %v830_v60, %v2854_v4  ;;  %v847_v6 = vrot.slane %v830_v60, %v2856_v5  ;;  %v903_v9 = vrot.slane %v898_v7, %v2850_v2 }
  0x69   : > { %v848_v8 = vcombine.low %v835_v62, %v839_v63  ;;  %v907_v10 = vrot.slane %v898_v7, %v2852_v3  ;;  %v911_v12 = vrot.slane %v898_v7, %v2854_v4  ;;  %v915_v13 = vrot.slane %v898_v7, %v2856_v5  ;;  %v1483_v63 = vld [vmem:[#allocation6 + $0x43] ss:$8 sm:$0xf] }
  0x6a   : > { %v849_v11 = vcombine.low %v843_v1, %v847_v6  ;;  %v971_v15 = vrot.slane %v966_v14, %v2850_v2  ;;  %v975_v16 = vrot.slane %v966_v14, %v2852_v3  ;;  %v979_v17 = vrot.slane %v966_v14, %v2854_v4 }
  0x6b   : > { %510 = vrot.lane.b32.xlu1 %v507_v33, %s2641_s28  ;;  %508 = vrot.lane.b32.xlu0 %v506_v36, %s2641_s28  ;;  %v916_v18 = vcombine.low %v903_v9, %v907_v10  ;;  %v917_v19 = vcombine.low %v911_v12, %v915_v13  ;;  %v983_v20 = vrot.slane %v966_v14, %v2856_v5  ;;  %v1550_v10 = vld [vmem:[#allocation6 + $0x44] ss:$8 sm:$0xf]  ;;  %vm445_vm3 = vcmask 64512  }
  0x6c   : > { %v984_v22 = vcombine.low %v971_v15, %v975_v16  ;;  %v1040_v23 = vrot.slane %v1035_v21, %v2850_v2  ;;  %v1044_v24 = vrot.slane %v1035_v21, %v2852_v3  ;;  %v1048_v26 = vrot.slane %v1035_v21, %v2854_v4 }
  0x6d   : > { %v985_v25 = vcombine.low %v979_v17, %v983_v20  ;;  %v1052_v27 = vrot.slane %v1035_v21, %v2856_v5  ;;  %v1108_v30 = vrot.slane %v1103_v28, %v2850_v2  ;;  %v1112_v31 = vrot.slane %v1103_v28, %v2852_v3  ;;  %v1616_v17 = vld [vmem:[#allocation6 + $0x45] ss:$8 sm:$0xf] }
  0x6e   : > { %v1053_v29 = vcombine.low %v1040_v23, %v1044_v24  ;;  %v1116_v33 = vrot.slane %v1103_v28, %v2854_v4  ;;  %v1120_v34 = vrot.slane %v1103_v28, %v2856_v5  ;;  %v1177_v37 = vrot.slane %v1172_v35, %v2850_v2  ;;  %v1683_v24 = vld [vmem:[#allocation6 + $0x46] ss:$8 sm:$0xf] }
  0x6f   : > { %576 = vrot.lane.b32.xlu0 %v574_v43, %s2642_s9  ;;  %578 = vrot.lane.b32.xlu1 %v575_v44, %s2642_s9  ;;  %v1054_v32 = vcombine.low %v1048_v26, %v1052_v27  ;;  %v1121_v36 = vcombine.low %v1108_v30, %v1112_v31  ;;  %v1181_v38 = vrot.slane %v1172_v35, %v2852_v3  ;;  %v1749_v31 = vld [vmem:[#allocation6 + $0x47] ss:$8 sm:$0xf]  ;;  %vm514_vm4 = vcmask 72704  }
  0x70   : > { %v1122_v39 = vcombine.low %v1116_v33, %v1120_v34  ;;  %v1185_v40 = vrot.slane %v1172_v35, %v2854_v4  ;;  %v1189_v41 = vrot.slane %v1172_v35, %v2856_v5  ;;  %v1245_v44 = vrot.slane %v1240_v42, %v2850_v2 }
  0x71   : > { %v1190_v43 = vcombine.low %v1177_v37, %v1181_v38  ;;  %v1249_v45 = vrot.slane %v1240_v42, %v2852_v3  ;;  %v1257_v48 = vrot.slane %v1240_v42, %v2856_v5  ;;  %v1318_v51 = vrot.slane %v1309_v49, %v2852_v3  ;;  %v1816_v38 = vld [vmem:[#allocation6 + $0x60] ss:$8 sm:$0xf] }
  0x72   : > { %v1191_v46 = vcombine.low %v1185_v40, %v1189_v41  ;;  %v1322_v52 = vrot.slane %v1309_v49, %v2854_v4  ;;  %v1326_v55 = vrot.slane %v1309_v49, %v2856_v5  ;;  %v1382_v58 = vrot.slane %v1377_v56, %v2850_v2 }
  0x73   : > { %645 = vrot.lane.b32.xlu0 %v643_v47, %s2643_s10  ;;  %647 = vrot.lane.b32.xlu1 %v644_v50, %s2643_s10  ;;  %v1253_v47 = vrot.slane %v1240_v42, %v2854_v4  ;;  %v1314_v50 = vrot.slane %v1309_v49, %v2850_v2  ;;  %v1258_v53 = vcombine.low %v1245_v44, %v1249_v45  ;;  %v1882_v45 = vld [vmem:[#allocation6 + $0x61] ss:$8 sm:$0xf]  ;;  %vm582_vm5 = vcmask 80896  }
  0x74   : > { %v1386_v59 = vrot.slane %v1377_v56, %v2852_v3  ;;  %v1328_v60 = vcombine.low %v1322_v52, %v1326_v55  ;;  %v1394_v62 = vrot.slane %v1377_v56, %v2856_v5  ;;  %v1488_v1 = vrot.slane %v1483_v63, %v2850_v2  ;;  %v1949_v52 = vld [vmem:[#allocation6 + $0x62] ss:$8 sm:$0xf] }
  0x75   : > { %v1492_v6 = vrot.slane %v1483_v63, %v2852_v3  ;;  %v1500_v9 = vrot.slane %v1483_v63, %v2856_v5  ;;  %v1555_v12 = vrot.slane %v1550_v10, %v2850_v2  ;;  %v1559_v13 = vrot.slane %v1550_v10, %v2852_v3 }
  0x76   : > { %v1563_v15 = vrot.slane %v1550_v10, %v2854_v4  ;;  %v1567_v16 = vrot.slane %v1550_v10, %v2856_v5  ;;  %v1625_v20 = vrot.slane %v1616_v17, %v2852_v3  ;;  %v1633_v23 = vrot.slane %v1616_v17, %v2856_v5 }
  0x77   : > { %713 = vrot.lane.b32.xlu0 %v711_v54, %s2644_s14  ;;  %715 = vrot.lane.b32.xlu1 %v712_v57, %s2644_s14  ;;  %v1259_v54 = vcombine.low %v1253_v47, %v1257_v48  ;;  %v1327_v57 = vcombine.low %v1314_v50, %v1318_v51  ;;  %v1692_v26 = vrot.slane %v1683_v24, %v2852_v3  ;;  %vm651_vm6 = vcmask 130048  }
  0x78   : > { %v1569_v21 = vcombine.low %v1563_v15, %v1567_v16  ;;  %v1696_v27 = vrot.slane %v1683_v24, %v2854_v4  ;;  %v1700_v30 = vrot.slane %v1683_v24, %v2856_v5  ;;  %v1754_v33 = vrot.slane %v1749_v31, %v2850_v2  ;;  %v349_v16 = vld [vmem:[%s2840_s13 + $0x10] sm:$0xf] }
  0x79   : > { %v1758_v34 = vrot.slane %v1749_v31, %v2852_v3  ;;  %v1766_v37 = vrot.slane %v1749_v31, %v2856_v5  ;;  %v1821_v40 = vrot.slane %v1816_v38, %v2850_v2  ;;  %v1825_v41 = vrot.slane %v1816_v38, %v2852_v3 }
  0x7a   : > { %v1702_v35 = vcombine.low %v1696_v27, %v1700_v30  ;;  %v1833_v44 = vrot.slane %v1816_v38, %v2856_v5  ;;  %v1887_v47 = vrot.slane %v1882_v45, %v2850_v2  ;;  %v1891_v48 = vrot.slane %v1882_v45, %v2852_v3 }
  0x7b   : > { %782 = vrot.lane.b32.xlu0 %v780_v61, %s2645_s20  ;;  %784 = vrot.lane.b32.xlu1 %v781_v0, %s2645_s20  ;;  %v1390_v61 = vrot.slane %v1377_v56, %v2854_v4  ;;  %v1395_v0 = vcombine.low %v1382_v58, %v1386_v59  ;;  %v1895_v50 = vrot.slane %v1882_v45, %v2854_v4  ;;  %vm719_vm7 = vcmask 138240  }
  0x7c   : > { %v1899_v51 = vrot.slane %v1882_v45, %v2856_v5  ;;  %v1958_v55 = vrot.slane %v1949_v52, %v2852_v3  ;;  %v1966_v58 = vrot.slane %v1949_v52, %v2856_v5  ;;  %v417_v45 = vld [vmem:[%s2840_s13 + $0x10] sm:$0xf]  ;;  %vm788_vm8 = vcmask 146432  }
  0x7d   : > { %v1396_v7 = vcombine.low %v1390_v61, %v1394_v62  ;;  %v243_v61 = vld [vmem:[#allocation6] ss:$8 sm:$0xf]  ;;  %vm856_vm9 = vcmask 523264   ;;  %vm924_vm10 = vcmask 531456   ;;  %vm992_vm11 = vcmask 539648  }
  0x7e   : > { %v1901_v56 = vcombine.low %v1895_v50, %v1899_v51  ;;  %v256_v62 = vrot.slane %v243_v61, %v2854_v4  ;;  %vm1061_vm12 = vcmask 588800   ;;  %vm1129_vm13 = vcmask 596992  }
  0x7f   : > { %850 = vrot.lane.b32.xlu0 %v848_v8, %s2646_s6  ;;  %852 = vrot.lane.b32.xlu1 %v849_v11, %s2646_s6  ;;  %v1496_v8 = vrot.slane %v1483_v63, %v2854_v4  ;;  %v1501_v11 = vcombine.low %v1488_v1, %v1492_v6  ;;  %v260_v63 = vrot.slane %v243_v61, %v2856_v5  ;;  %vm1198_vm14 = vcmask 605184  }
  0x80   : > { %vm334_vm15 = vcmask 1039360  }
  0x81   : > { %v1502_v14 = vcombine.low %v1496_v8, %v1500_v9  ;;  %v262_v6 = vcombine.low %v256_v62, %v260_v63  ;;  %v2995_v8 = vld [vmem:[%s2840_s13] sm:$0xff]  ;;  %v242_v9 = vld [vmem:[%s2840_s13 + $0x8] sm:$0xff] }
  0x83   : > { %918 = vrot.lane.b32.xlu0 %v916_v18, %s2647_s5  ;;  %920 = vrot.lane.b32.xlu1 %v917_v19, %s2647_s5  ;;  %s2653_s5 = smov 81   ;;  %v1568_v18 = vcombine.low %v1555_v12, %v1559_v13  ;;  %v1621_v19 = vrot.slane %v1616_v17, %v2850_v2  ;;  %v266_v10 = vmul.f32 %v262_v6, %v242_v9 }
  0x85   : > { %v1634_v28 = vcombine.low %v1621_v19, %v1625_v20  ;;  %275 = vst [vmem:[#allocation2 + $0x10] sm:$0xf] %v266_v10 }
  0x87   : > { %986 = vrot.lane.b32.xlu0 %v984_v22, %s2648_s7  ;;  %988 = vrot.lane.b32.xlu1 %v985_v25, %s2648_s7  ;;  %s2654_s7 = smov 82   ;;  %v1629_v22 = vrot.slane %v1616_v17, %v2854_v4  ;;  %v1688_v25 = vrot.slane %v1683_v24, %v2850_v2  ;;  %v270_v17 = vcombine.high %v266_v10, %v266_v10  ;;  %v279_v24 = vld [vmem:[%s2840_s13 + $0x10] sm:$0xf] }
  0x89   : > { %276 = vst [vmem:[#allocation2 + $0x18] sm:$0xf] %v270_v17 }
  0x8b   : > { %1055 = vrot.lane.b32.xlu0 %v1053_v29, %s2649_s25  ;;  %1057 = vrot.lane.b32.xlu1 %v1054_v32, %s2649_s25  ;;  %v1635_v29 = vcombine.low %v1629_v22, %v1633_v23  ;;  %v1701_v32 = vcombine.low %v1688_v25, %v1692_v26  ;;  %s2663_s25 = smov 63  }
  0x8f   : > { %1123 = vrot.lane.b32.xlu0 %v1121_v36, %s2650_s29  ;;  %1125 = vrot.lane.b32.xlu1 %v1122_v39, %s2650_s29  ;;  %v1762_v36 = vrot.slane %v1749_v31, %v2854_v4  ;;  %v1767_v39 = vcombine.low %v1754_v33, %v1758_v34  ;;  %s2664_s29 = smov 62  }
  0x91   : > { %v1768_v42 = vcombine.low %v1762_v36, %v1766_v37  ;;  %v3020_v36 = vld [vmem:[%s2840_s13 + $0x8] sm:$0xff] }
  0x93   : > { %1192 = vrot.lane.b32.xlu0 %v1190_v43, %s2651_s11  ;;  %1194 = vrot.lane.b32.xlu1 %v1191_v46, %s2651_s11  ;;  %v1829_v43 = vrot.slane %v1816_v38, %v2854_v4  ;;  %v1834_v46 = vcombine.low %v1821_v40, %v1825_v41  ;;  %v248_v40 = vrot.slane %v243_v61, %v2850_v2  ;;  %s2665_s11 = smov 56  }
  0x94   : > { %v252_v41 = vrot.slane %v243_v61, %v2852_v3 }
  0x95   : > { %v1835_v49 = vcombine.low %v1829_v43, %v1833_v44 }
  0x97   : > { %1260 = vrot.lane.b32.xlu0 %v1258_v53, %s2652_s12  ;;  %1262 = vrot.lane.b32.xlu1 %v1259_v54, %s2652_s12  ;;  %v1900_v53 = vcombine.low %v1887_v47, %v1891_v48  ;;  %v1954_v54 = vrot.slane %v1949_v52, %v2850_v2  ;;  %v241_v48 = vld [vmem:[%s2840_s13] sm:$0xff]  ;;  %s2667_s12 = smov 54  }
  0x99   : > { %v1967_v59 = vcombine.low %v1954_v54, %v1958_v55 }
  0x9b   : > { %1329 = vrot.lane.b32.xlu0 %v1327_v57, %s2653_s5  ;;  %1331 = vrot.lane.b32.xlu1 %v1328_v60, %s2653_s5  ;;  %v1962_v57 = vrot.slane %v1949_v52, %v2854_v4  ;;  %s2668_s5 = smov 48  }
  0x9d   : > { %v1968_v60 = vcombine.low %v1962_v57, %v1966_v58 }
  0x9f   : > { %1397 = vrot.lane.b32.xlu0 %v1395_v0, %s2654_s7  ;;  %1399 = vrot.lane.b32.xlu1 %v1396_v7, %s2654_s7  ;;  %s2669_s7 = smov 47  }
  0xa3   : > { %1503 = vrot.lane.b32.xlu0 %v1501_v11, %s2639_s23  ;;  %1505 = vrot.lane.b32.xlu1 %v1502_v14, %s2639_s23  ;;  %s2656_s23 = smov 126  }
  0xa7   : > { %1570 = vrot.lane.b32.xlu0 %v1568_v18, %s2638_s21  ;;  %1572 = vrot.lane.b32.xlu1 %v1569_v21, %s2638_s21  ;;  %s2655_s21 = smov 127  }
  0xab   : > { %1636 = vrot.lane.b32.xlu0 %v1634_v28, %s2640_s26  ;;  %1638 = vrot.lane.b32.xlu1 %v1635_v29, %s2640_s26  ;;  %s2657_s26 = smov 120  }
  0xaf   : > { %1703 = vrot.lane.b32.xlu0 %v1701_v32, %s2641_s28  ;;  %1705 = vrot.lane.b32.xlu1 %v1702_v35, %s2641_s28  ;;  %s2658_s28 = smov 119  }
  0xb3   : > { %1769 = vrot.lane.b32.xlu0 %v1767_v39, %s2642_s9  ;;  %1771 = vrot.lane.b32.xlu1 %v1768_v42, %s2642_s9  ;;  %s2659_s9 = smov 118  }
  0xb7   : > { %1836 = vrot.lane.b32.xlu0 %v1834_v46, %s2643_s10  ;;  %1838 = vrot.lane.b32.xlu1 %v1835_v49, %s2643_s10  ;;  %v261_v49 = vcombine.low %v248_v40, %v252_v41  ;;  %v554_v41 = vld [vmem:[%s2840_s13 + $0x10] sm:$0xf]  ;;  %s2660_s10 = smov 112  }
  0xb9   : > { %v265_v52 = vmul.f32 %v261_v49, %v241_v48 }
  0xbb   : > { %1902 = vrot.lane.b32.xlu0 %v1900_v53, %s2644_s14  ;;  %1904 = vrot.lane.b32.xlu1 %v1901_v56, %s2644_s14  ;;  %273 = vst [vmem:[#allocation2] sm:$0xf] %v265_v52  ;;  %s2661_s14 = smov 111  }
  0xbf   : > { %1969 = vrot.lane.b32.xlu0 %v1967_v59, %s2645_s20  ;;  %1971 = vrot.lane.b32.xlu1 %v1968_v60, %s2645_s20  ;;  %v269_v59 = vcombine.high %v265_v52, %v265_v52  ;;  %s2662_s20 = smov 110  }
  0xc1   : > { %274 = vst [vmem:[#allocation2 + $0x8] sm:$0xf] %v269_v59 }
  0xd1   : > { %v372_v0 = vpop.permute.xlu1 %371  ;;  %v302_v1 = vpop.permute.xlu0 %301 }
  0xd2   : > { %v305_v7 = vrot.slane %v302_v1, 4  ;;  %v375_v12 = vrot.slane %v372_v0, 4 }
  0xd4   : > { %v308_v11 = vsel %vm307_vm0, %v305_v7, %v302_v1  ;;  %v378_v21 = vsel %vm377_vm1, %v375_v12, %v372_v0 }
  0xd5   : > { %v374_v13 = vpop.permute.xlu1 %373  ;;  %v304_v14 = vpop.permute.xlu0 %303  ;;  %v3000_v15 = vmul.f32 %v308_v11, %v2995_v8  ;;  %v384_v29 = vmul.f32 %v378_v21, %v2995_v8 }
  0xd6   : > { %v376_v18 = vrot.slane %v374_v13, 4  ;;  %v306_v19 = vrot.slane %v304_v14, 4 }
  0xd7   : > { %326 = vrot.lane.b32.xlu0 %v3000_v15, %s2655_s21 }
  0xd8   : > { %v386_v20 = vmul.f32 %v376_v18, %v349_v16  ;;  %v310_v27 = vsel %vm309_vm2, %v305_v7, %v306_v19  ;;  %v317_v30 = vmul.f32 %v306_v19, %v279_v24  ;;  %v379_v34 = vsel %vm309_vm2, %v375_v12, %v376_v18 }
  0xd9   : > { %v442_v22 = vpop.permute.xlu1 %441  ;;  %v440_v23 = vpop.permute.xlu0 %439  ;;  %v311_v35 = vsel %vm307_vm0, %v310_v27, %v304_v14  ;;  %v380_v43 = vsel %vm377_vm1, %v379_v34, %v374_v13  ;;  %v390_v7 = vcombine.high %v384_v29, %v384_v29  ;;  %v321_v12 = vcombine.low %v3000_v15, %v3000_v15 }
  0xda   : > { %v444_v25 = vrot.slane %v442_v22, 4  ;;  %v443_v26 = vrot.slane %v440_v23, 4  ;;  %400 = vrot.lane.b32.xlu1 %v386_v20, %s2656_s23  ;;  %v323_v42 = vcombine.low %v317_v30, %v317_v30  ;;  %v316_v44 = vmul.f32 %v311_v35, %v3020_v36 }
  0xdb   : > { %v385_v53 = vmul.f32 %v380_v43, %v3020_v36 }
  0xdc   : > { %v446_v28 = vsel %vm445_vm3, %v443_v26, %v440_v23  ;;  %v447_v37 = vsel %vm309_vm2, %v443_v26, %v444_v25  ;;  %v454_v54 = vmul.f32 %v444_v25, %v417_v45  ;;  %v322_v11 = vcombine.low %v316_v44, %v316_v44 }
  0xdd   : > { %v3012_v31 = vmul.f32 %v446_v28, %v2995_v8  ;;  %v3014_v32 = vpop.permute.xlu1 %510  ;;  %v509_v33 = vpop.permute.xlu0 %508  ;;  %v448_v50 = vsel %vm445_vm3, %v447_v37, %v442_v22  ;;  %v391_v25 = vcombine.high %v385_v53, %v385_v53 }
  0xde   : > { %392 = vrot.lane.b32.xlu1 %v384_v29, %s2656_s23  ;;  %v513_v38 = vrot.slane %v3014_v32, 4  ;;  %v512_v39 = vrot.slane %v509_v33, 4  ;;  %v453_v56 = vmul.f32 %v448_v50, %v3020_v36  ;;  %v460_v62 = vcombine.low %v454_v54, %v454_v54 }
  0xdf   : > { %463 = vrot.lane.b32.xlu0 %v3012_v31, %s2657_s26  ;;  %v458_v19 = vcombine.low %v3012_v31, %v3012_v31  ;;  %v486_v31 = vld [vmem:[%s2840_s13 + $0x10] sm:$0xf] }
  0xe0   : > { %v516_v51 = vsel %vm309_vm2, %v512_v39, %v513_v38  ;;  %v515_v55 = vsel %vm514_vm4, %v512_v39, %v509_v33  ;;  %v459_v18 = vcombine.low %v453_v56, %v453_v56  ;;  %v523_v34 = vmul.f32 %v513_v38, %v486_v31 }
  0xe1   : > { %v577_v46 = vpop.permute.xlu0 %576  ;;  %v3031_v47 = vpop.permute.xlu1 %578  ;;  %v517_v60 = vsel %vm514_vm4, %v516_v51, %v3014_v32  ;;  %v3050_v61 = vmul.f32 %v515_v55, %v2995_v8 }
  0xe2   : > { %332 = vrot.lane.b32.xlu1 %v323_v42, %s2655_s21  ;;  %v522_v63 = vmul.f32 %v517_v60, %v3020_v36  ;;  %v580_v16 = vrot.slane %v577_v46, 4  ;;  %v581_v17 = vrot.slane %v3031_v47, 4 }
  0xe3   : > { %330 = vrot.lane.b32.xlu0 %v316_v44, %s2655_s21  ;;  %v527_v6 = vcombine.high %v3050_v61, %v3050_v61 }
  0xe4   : > { %v583_v21 = vsel %vm582_vm5, %v580_v16, %v577_v46  ;;  %v584_v22 = vsel %vm309_vm2, %v580_v16, %v581_v17  ;;  %v528_v23 = vcombine.high %v522_v63, %v522_v63  ;;  %v591_v43 = vmul.f32 %v581_v17, %v554_v41 }
  0xe5   : > { %v646_v57 = vpop.permute.xlu0 %645  ;;  %v3043_v58 = vpop.permute.xlu1 %647  ;;  %v585_v28 = vsel %vm582_vm5, %v584_v22, %v3031_v47  ;;  %v3095_v30 = vmul.f32 %v583_v21, %v2995_v8 }
  0xe6   : > { %396 = vrot.lane.b32.xlu1 %v385_v53, %s2656_s23  ;;  %v649_v24 = vrot.slane %v646_v57, 4  ;;  %v650_v29 = vrot.slane %v3043_v58, 4  ;;  %v590_v35 = vmul.f32 %v585_v28, %v3020_v36  ;;  %v597_v50 = vcombine.low %v591_v43, %v591_v43 }
  0xe7   : > { %467 = vrot.lane.b32.xlu0 %v453_v56, %s2657_s26 }
  0xe8   : > { %v652_v33 = vsel %vm651_vm6, %v649_v24, %v646_v57  ;;  %v653_v40 = vsel %vm309_vm2, %v649_v24, %v650_v29  ;;  %v596_v38 = vcombine.low %v590_v35, %v590_v35  ;;  %v623_v57 = vld [vmem:[%s2840_s13 + $0x10] sm:$0xf] }
  0xe9   : > { %v3053_v0 = vpop.permute.xlu0 %713  ;;  %v3055_v1 = vpop.permute.xlu1 %715  ;;  %v658_v42 = vmul.f32 %v652_v33, %v2995_v8  ;;  %v654_v32 = vsel %vm651_vm6, %v653_v40, %v3043_v58 }
  0xea   : > { %469 = vrot.lane.b32.xlu1 %v460_v62, %s2657_s26  ;;  %v718_v46 = vrot.slane %v3055_v1, 4  ;;  %v659_v47 = vmul.f32 %v654_v32, %v3020_v36  ;;  %v717_v49 = vrot.slane %v3053_v0, 4  ;;  %v660_v62 = vmul.f32 %v650_v29, %v623_v57  ;;  %v760_v32 = vld [vmem:[%s2840_s13 + $0x10] sm:$0xf] }
  0xeb   : > { %533 = vrot.lane.b32.xlu0 %v522_v63, %s2658_s28  ;;  %v664_v48 = vcombine.high %v658_v42, %v658_v42 }
  0xec   : > { %v721_v53 = vsel %vm309_vm2, %v717_v49, %v718_v46  ;;  %v665_v54 = vcombine.high %v659_v47, %v659_v47  ;;  %v720_v55 = vsel %vm719_vm7, %v717_v49, %v3053_v0  ;;  %v691_v0 = vld [vmem:[%s2840_s13 + $0x10] sm:$0xf] }
  0xed   : > { %v3061_v9 = vpop.permute.xlu0 %782  ;;  %v3063_v10 = vpop.permute.xlu1 %784  ;;  %v722_v56 = vsel %vm719_vm7, %v721_v53, %v3055_v1  ;;  %v726_v60 = vmul.f32 %v720_v55, %v2995_v8  ;;  %v828_v49 = vld [vmem:[%s2840_s13 + $0x10] sm:$0xf] }
  0xee   : > { %531 = vrot.lane.b32.xlu1 %v527_v6, %s2658_s28  ;;  %v727_v63 = vmul.f32 %v722_v56, %v3020_v36  ;;  %v786_v6 = vrot.slane %v3061_v9, 4  ;;  %v787_v16 = vrot.slane %v3063_v10, 4 }
  0xef   : > { %394 = vrot.lane.b32.xlu0 %v390_v7, %s2656_s23 }
  0xf0   : > { %v733_v7 = vcombine.low %v727_v63, %v727_v63  ;;  %v789_v17 = vsel %vm788_vm8, %v786_v6, %v3061_v9  ;;  %v595_v9 = vcombine.low %v3095_v30, %v3095_v30 }
  0xf1   : > { %v3069_v13 = vpop.permute.xlu0 %850  ;;  %v3071_v14 = vpop.permute.xlu1 %852 }
  0xf2   : > { %328 = vrot.lane.b32.xlu1 %v322_v11, %s2655_s21  ;;  %v728_v11 = vmul.f32 %v718_v46, %v691_v0  ;;  %v854_v31 = vrot.slane %v3069_v13, 4 }
  0xf3   : > { %324 = vrot.lane.b32.xlu0 %v321_v12, %s2655_s21 }
  0xf5   : > { %v3078_v20 = vpop.permute.xlu0 %918  ;;  %v3080_v15 = vpop.permute.xlu1 %920 }
  0xf6   : > { %465 = vrot.lane.b32.xlu1 %v459_v18, %s2657_s26  ;;  %v734_v18 = vcombine.low %v728_v11, %v728_v11  ;;  %v922_v40 = vrot.slane %v3078_v20, 4 }
  0xf7   : > { %461 = vrot.lane.b32.xlu0 %v458_v19, %s2657_s26  ;;  %v790_v19 = vsel %vm309_vm2, %v786_v6, %v787_v16 }
  0xf8   : > { %v791_v24 = vsel %vm788_vm8, %v790_v19, %v3063_v10  ;;  %v732_v10 = vcombine.low %v726_v60, %v726_v60  ;;  %v925_v46 = vsel %vm924_vm10, %v922_v40, %v3078_v20 }
  0xf9   : > { %v3086_v26 = vpop.permute.xlu0 %986  ;;  %v3088_v27 = vpop.permute.xlu1 %988 }
  0xfa   : > { %535 = vrot.lane.b32.xlu1 %v528_v23, %s2658_s28  ;;  %v3166_v23 = vmul.f32 %v789_v17, %v2995_v8  ;;  %v991_v57 = vrot.slane %v3088_v27, 4 }
  0xfb   : > { %398 = vrot.lane.b32.xlu0 %v391_v25, %s2656_s23  ;;  %v855_v25 = vrot.slane %v3071_v14, 4 }
  0xfc   : > { %v801_v28 = vcombine.high %v3166_v23, %v3166_v23 }
  0xfd   : > { %v3103_v37 = vpop.permute.xlu0 %1055  ;;  %v3105_v39 = vpop.permute.xlu1 %1057  ;;  %v865_v20 = vmul.f32 %v855_v25, %v828_v49 }
  0xfe   : > { %600 = vrot.lane.b32.xlu1 %v3095_v30, %s2659_s9  ;;  %v858_v30 = vsel %vm309_vm2, %v854_v31, %v855_v25 }
  0xff   : > { %537 = vrot.lane.b32.xlu0 %v523_v34, %s2658_s28  ;;  %v859_v41 = vsel %vm856_vm9, %v858_v30, %v3071_v14  ;;  %v871_v0 = vcombine.low %v865_v20, %v865_v20 }
 0x100   : > { %v864_v14 = vmul.f32 %v859_v41, %v3020_v36 }
 0x101   : > { %v3115_v44 = vpop.permute.xlu0 %1123  ;;  %v3117_v45 = vpop.permute.xlu1 %1125 }
 0x102   : > { %604 = vrot.lane.b32.xlu1 %v590_v35, %s2659_s9  ;;  %v857_v35 = vsel %vm856_vm9, %v854_v31, %v3069_v13  ;;  %v870_v55 = vcombine.low %v864_v14, %v864_v14  ;;  %v1059_v31 = vrot.slane %v3103_v37, 4  ;;  %v1127_v49 = vrot.slane %v3115_v44, 4 }
 0x103   : > { %602 = vrot.lane.b32.xlu0 %v596_v38, %s2659_s9  ;;  %v3200_v13 = vmul.f32 %v857_v35, %v2995_v8 }
 0x104   : > { %v1130_v20 = vsel %vm1129_vm13, %v1127_v49, %v3115_v44 }
 0x105   : > { %v3124_v51 = vpop.permute.xlu0 %1192  ;;  %v3126_v52 = vpop.permute.xlu1 %1194 }
 0x106   : > { %668 = vrot.lane.b32.xlu1 %v664_v48, %s2660_s10 }
 0x107   : > { %606 = vrot.lane.b32.xlu0 %v597_v50, %s2659_s9  ;;  %v931_v50 = vmul.f32 %v925_v46, %v2995_v8 }
 0x109   : > { %v3137_v58 = vpop.permute.xlu1 %1262  ;;  %v3140_v59 = vpop.permute.xlu0 %1260 }
 0x10a   : > { %672 = vrot.lane.b32.xlu1 %v665_v54, %s2660_s10 }
 0x10b   : > { %670 = vrot.lane.b32.xlu0 %v659_v47, %s2660_s10  ;;  %v797_v47 = vmul.f32 %v787_v16, %v760_v32 }
 0x10d   : > { %v3147_v1 = vpop.permute.xlu1 %1331  ;;  %v3150_v12 = vpop.permute.xlu0 %1329 }
 0x10e   : > { %737 = vrot.lane.b32.xlu1 %v726_v60, %s2661_s14 }
 0x10f   : > { %674 = vrot.lane.b32.xlu0 %v660_v62, %s2660_s10  ;;  %v937_v62 = vcombine.high %v931_v50, %v931_v50 }
 0x111   : > { %v3160_v21 = vpop.permute.xlu1 %1399  ;;  %v3163_v22 = vpop.permute.xlu0 %1397 }
 0x112   : > { %741 = vrot.lane.b32.xlu1 %v727_v63, %s2661_s14  ;;  %v990_v63 = vrot.slane %v3086_v26, 4 }
 0x113   : > { %739 = vrot.lane.b32.xlu0 %v733_v7, %s2661_s14 }
 0x114   : > { %v994_v6 = vsel %vm309_vm2, %v990_v63, %v991_v57  ;;  %v993_v16 = vsel %vm992_vm11, %v990_v63, %v3086_v26  ;;  %v1197_v63 = vrot.slane %v3126_v52, 4 }
 0x115   : > { %v3178_v29 = vpop.permute.xlu1 %1505  ;;  %v3181_v33 = vpop.permute.xlu0 %1503  ;;  %v995_v17 = vsel %vm992_vm11, %v994_v6, %v3088_v27  ;;  %v999_v19 = vmul.f32 %v993_v16, %v2995_v8  ;;  %vm471_vm11 = vcmask 982016  }
 0x116   : > { %529 = vrot.lane.b32.xlu1 %v3050_v61, %s2658_s28  ;;  %v796_v61 = vmul.f32 %v791_v24, %v3020_v36 }
 0x117   : > { %743 = vrot.lane.b32.xlu0 %v734_v18, %s2661_s14  ;;  %v896_v18 = vld [vmem:[%s2840_s13 + $0x10] sm:$0xf] }
 0x118   : > { %v802_v34 = vcombine.high %v796_v61, %v796_v61 }
 0x119   : > { %v3194_v38 = vpop.permute.xlu1 %1572  ;;  %v3197_v43 = vpop.permute.xlu0 %1570 }
 0x11a   : > { %666 = vrot.lane.b32.xlu1 %v658_v42, %s2660_s10  ;;  %v923_v42 = vrot.slane %v3080_v15, 4 }
 0x11b   : > { %598 = vrot.lane.b32.xlu0 %v595_v9, %s2659_s9  ;;  %v1000_v9 = vmul.f32 %v995_v17, %v3020_v36 }
 0x11c   : > { %v926_v48 = vsel %vm309_vm2, %v922_v40, %v923_v42  ;;  %v933_v25 = vmul.f32 %v923_v42, %v896_v18  ;;  %v1062_v40 = vsel %vm1061_vm12, %v1059_v31, %v3103_v37  ;;  %v1128_v37 = vrot.slane %v3117_v45, 4 }
 0x11d   : > { %v3211_v53 = vpop.permute.xlu1 %1638  ;;  %v927_v54 = vsel %vm924_vm10, %v926_v48, %v3080_v15  ;;  %v3215_v56 = vpop.permute.xlu0 %1636  ;;  %v1006_v27 = vcombine.low %v1000_v9, %v1000_v9  ;;  %v3257_v42 = vmul.f32 %v1062_v40, %v2995_v8  ;;  %vm1266_vm10 = vcmask 654336  }
 0x11e   : > { %805 = vrot.lane.b32.xlu1 %v801_v28, %s2662_s20  ;;  %v932_v60 = vmul.f32 %v927_v54, %v3020_v36  ;;  %v964_v28 = vld [vmem:[%s2840_s13 + $0x10] sm:$0xf] }
 0x11f   : > { %735 = vrot.lane.b32.xlu0 %v732_v10, %s2661_s14  ;;  %v1001_v26 = vmul.f32 %v991_v57, %v964_v28  ;;  %v1060_v10 = vrot.slane %v3105_v39, 4  ;;  %v1196_v57 = vrot.slane %v3124_v51, 4 }
 0x120   : > { %v938_v11 = vcombine.high %v932_v60, %v932_v60 }
 0x121   : > { %v3223_v15 = vpop.permute.xlu1 %1705  ;;  %v3227_v7 = vpop.permute.xlu0 %1703  ;;  %v1007_v35 = vcombine.low %v1001_v26, %v1001_v26  ;;  %v1063_v41 = vsel %vm309_vm2, %v1059_v31, %v1060_v10  ;;  %v1199_v16 = vsel %vm1198_vm14, %v1196_v57, %v3124_v51  ;;  %v1200_v18 = vsel %vm309_vm2, %v1196_v57, %v1197_v63 }
 0x122   : > { %809 = vrot.lane.b32.xlu1 %v802_v34, %s2662_s20  ;;  %v1064_v46 = vsel %vm1061_vm12, %v1063_v41, %v3105_v39  ;;  %v1005_v39 = vcombine.low %v999_v19, %v999_v19  ;;  %v1201_v51 = vsel %vm1198_vm14, %v1200_v18, %v3126_v52  ;;  %v1264_v41 = vrot.slane %v3140_v59, 4 }
 0x123   : > { %807 = vrot.lane.b32.xlu0 %v796_v61, %s2662_s20  ;;  %v1069_v48 = vmul.f32 %v1064_v46, %v3020_v36  ;;  %vm539_vm12 = vcmask 973824   ;;  %vm1335_vm14 = vcmask 662528  }
 0x125   : > { %v3235_v24 = vpop.permute.xlu1 %1771  ;;  %v3238_v61 = vpop.permute.xlu0 %1769 }
 0x126   : > { %874 = vrot.lane.b32.xlu1 %v3200_v13, %s2646_s6 }
 0x127   : > { %811 = vrot.lane.b32.xlu0 %v797_v47, %s2662_s20  ;;  %v869_v47 = vcombine.low %v3200_v13, %v3200_v13 }
 0x129   : > { %v3246_v30 = vpop.permute.xlu1 %1838  ;;  %v3249_v34 = vpop.permute.xlu0 %1836 }
 0x12a   : > { %878 = vrot.lane.b32.xlu1 %v864_v14, %s2646_s6 }
 0x12b   : > { %876 = vrot.lane.b32.xlu0 %v870_v55, %s2646_s6  ;;  %v1075_v55 = vcombine.high %v1069_v48, %v1069_v48 }
 0x12d   : > { %v3259_v32 = vpop.permute.xlu1 %1904  ;;  %v3264_v14 = vpop.permute.xlu0 %1902 }
 0x12e   : > { %941 = vrot.lane.b32.xlu1 %v937_v62, %s2663_s25 }
 0x12f   : > { %880 = vrot.lane.b32.xlu0 %v871_v0, %s2646_s6  ;;  %v3288_v0 = vmul.f32 %v1130_v20, %v2995_v8 }
 0x131   : > { %v3274_v13 = vpop.permute.xlu1 %1971  ;;  %v3277_v54 = vpop.permute.xlu0 %1969 }
 0x132   : > { %945 = vrot.lane.b32.xlu1 %v938_v11, %s2663_s25 }
 0x133   : > { %943 = vrot.lane.b32.xlu0 %v932_v60, %s2663_s25  ;;  %v1033_v60 = vld [vmem:[%s2840_s13 + $0x10] sm:$0xf] }
 0x134   : > { %v1070_v11 = vmul.f32 %v1060_v10, %v1033_v60  ;;  %v1206_v10 = vmul.f32 %v1201_v51, %v3020_v36 }
 0x136   : > { %1010 = vrot.lane.b32.xlu1 %v999_v19, %s2664_s29  ;;  %v3303_v19 = vmul.f32 %v1199_v16, %v2995_v8 }
 0x137   : > { %947 = vrot.lane.b32.xlu0 %v933_v25, %s2663_s25 }
 0x138   : > { %v1211_v31 = vcombine.high %v3303_v19, %v3303_v19 }
 0x13a   : > { %1014 = vrot.lane.b32.xlu1 %v1000_v9, %s2664_s29 }
 0x13b   : > { %1012 = vrot.lane.b32.xlu0 %v1006_v27, %s2664_s29  ;;  %v1265_v27 = vrot.slane %v3137_v58, 4 }
 0x13e   : > { %803 = vrot.lane.b32.xlu1 %v3166_v23, %s2662_s20  ;;  %v1074_v23 = vcombine.high %v3257_v42, %v3257_v42 }
 0x13f   : > { %1016 = vrot.lane.b32.xlu0 %v1007_v35, %s2664_s29 }
 0x142   : > { %939 = vrot.lane.b32.xlu1 %v931_v50, %s2663_s25  ;;  %v1131_v50 = vsel %vm309_vm2, %v1127_v49, %v1128_v37  ;;  %s2670_s25 = smov 46  }
 0x143   : > { %872 = vrot.lane.b32.xlu0 %v869_v47, %s2646_s6  ;;  %v1132_v62 = vsel %vm1129_vm13, %v1131_v50, %v3117_v45  ;;  %v1101_v45 = vld [vmem:[%s2840_s13 + $0x10] sm:$0xf]  ;;  %s2666_s6 = smov 55   ;;  %v1268_v47 = vsel %vm309_vm2, %v1264_v41, %v1265_v27  ;;  %vm402_vm13 = vcmask 1031168  }
 0x144   : > { %v1137_v44 = vmul.f32 %v1132_v62, %v3020_v36  ;;  %v1138_v25 = vmul.f32 %v1128_v37, %v1101_v45  ;;  %v1212_v37 = vcombine.high %v1206_v10, %v1206_v10  ;;  %v1269_v50 = vsel %vm1266_vm10, %v1268_v47, %v3137_v58 }
 0x145   : > { %v1274_v60 = vmul.f32 %v1269_v50, %v3020_v36  ;;  %v1142_v47 = vcombine.low %v3288_v0, %v3288_v0  ;;  %v1402_v50 = vrot.slane %v3160_v21, 4 }
 0x146   : > { %1078 = vrot.lane.b32.xlu1 %v1074_v23, %s2665_s11  ;;  %v1143_v28 = vcombine.low %v1137_v44, %v1137_v44  ;;  %v1144_v40 = vcombine.low %v1138_v25, %v1138_v25  ;;  %v1334_v25 = vrot.slane %v3147_v1, 4 }
 0x147   : > { %1008 = vrot.lane.b32.xlu0 %v1005_v39, %s2664_s29  ;;  %v1170_v39 = vld [vmem:[%s2840_s13 + $0x10] sm:$0xf]  ;;  %v1280_v16 = vcombine.low %v1274_v60, %v1274_v60 }
 0x148   : > { %v1207_v57 = vmul.f32 %v1197_v63, %v1170_v39  ;;  %v1333_v63 = vrot.slane %v3150_v12, 4 }
 0x149   : > { %v3295_v17 = vpop.permute.xlu0 %326 }
 0x14a   : > { %1082 = vrot.lane.b32.xlu1 %v1075_v55, %s2665_s11 }
 0x14b   : > { %1080 = vrot.lane.b32.xlu0 %v1069_v48, %s2665_s11  ;;  %v1267_v48 = vsel %vm1266_vm10, %v1264_v41, %v3140_v59  ;;  %v1238_v59 = vld [vmem:[%s2840_s13 + $0x10] sm:$0xf]  ;;  %v1337_v41 = vsel %vm309_vm2, %v1333_v63, %v1334_v25  ;;  %vm1403_vm10 = vcmask 670720  }
 0x14c   : > { %v3290_v6 = vpop.permute.xlu1 %400  ;;  %v3328_v55 = vmul.f32 %v1267_v48, %v2995_v8 }
 0x14e   : > { %1147 = vrot.lane.b32.xlu1 %v3288_v0, %s2666_s6 }
 0x14f   : > { %1084 = vrot.lane.b32.xlu0 %v1070_v11, %s2665_s11 }
 0x150   : > { %v393_v9 = vpop.permute.xlu1 %392 }
 0x151   : > { %v3307_v26 = vpop.permute.xlu0 %463 }
 0x152   : > { %1151 = vrot.lane.b32.xlu1 %v1137_v44, %s2666_s6  ;;  %v1275_v44 = vmul.f32 %v1265_v27, %v1238_v59 }
 0x153   : > { %1149 = vrot.lane.b32.xlu0 %v1143_v28, %s2666_s6 }
 0x154   : > { %v333_v35 = vpop.permute.xlu1 %332 }
 0x155   : > { %v331_v52 = vpop.permute.xlu0 %330 }
 0x156   : > { %v338_v46 = vsel %vm334_vm15, %v331_v52, %v333_v35  ;;  %1215 = vrot.lane.b32.xlu1 %v1211_v31, %s2667_s12  ;;  %v1281_v31 = vcombine.low %v1275_v44, %v1275_v44  ;;  %v1445_v44 = vld [vmem:[#allocation6 + $0x42] ss:$8 sm:$0xf] }
 0x157   : > { %346 = vst [vmem:[#allocation2 + $0x18] sm:$0xf0] %v338_v46  ;;  %1153 = vrot.lane.b32.xlu0 %v1144_v40, %s2666_s6 }
 0x158   : > { %v3320_v23 = vpop.permute.xlu1 %396 }
 0x159   : > { %v468_v49 = vpop.permute.xlu0 %467 }
 0x15a   : > { %1219 = vrot.lane.b32.xlu1 %v1212_v37, %s2667_s12  ;;  %v1338_v37 = vsel %vm1335_vm14, %v1337_v41, %v3147_v1  ;;  %v1508_v41 = vrot.slane %v3178_v29, 4 }
 0x15b   : > { %1217 = vrot.lane.b32.xlu0 %v1206_v10, %s2667_s12  ;;  %v1336_v10 = vsel %vm1335_vm14, %v1333_v63, %v3150_v12  ;;  %vm608_vm14 = vcmask 965632  }
 0x15c   : > { %v470_v20 = vpop.permute.xlu1 %469  ;;  %v3361_v12 = vmul.f32 %v1336_v10, %v2995_v8  ;;  %v1462_v10 = vrot.slane %v1445_v44, %v2856_v5 }
 0x15d   : > { %v475_v62 = vsel %vm471_vm11, %v468_v49, %v470_v20  ;;  %v534_v11 = vpop.permute.xlu0 %533  ;;  %v1343_v20 = vmul.f32 %v1338_v37, %v3020_v36 }
 0x15e   : > { %483 = vst [vmem:[#allocation2 + $0x38] sm:$0xf0] %v475_v62  ;;  %1284 = vrot.lane.b32.xlu1 %v3328_v55, %s2668_s5  ;;  %v1348_v0 = vcombine.high %v3361_v12, %v3361_v12 }
 0x15f   : > { %1221 = vrot.lane.b32.xlu0 %v1207_v57, %s2667_s12  ;;  %v1279_v57 = vcombine.low %v3328_v55, %v3328_v55 }
 0x160   : > { %v3336_v58 = vpop.permute.xlu1 %531 }
 0x161   : > { %v541_v45 = vsel %vm539_vm12, %v3336_v58, %v534_v11  ;;  %v395_v18 = vpop.permute.xlu0 %394 }
 0x162   : > { %549 = vst [vmem:[#allocation2 + $0x48] sm:$0xf] %v541_v45  ;;  %v403_v28 = vsel %vm402_vm13, %v393_v9, %v395_v18  ;;  %v404_v51 = vsel %vm402_vm13, %v395_v18, %v3320_v23  ;;  %1288 = vrot.lane.b32.xlu1 %v1274_v60, %s2668_s5  ;;  %v1401_v60 = vrot.slane %v3163_v22, 4 }
 0x163   : > { %411 = vst [vmem:[#allocation2 + $0x20] sm:$0xf] %v403_v28  ;;  %412 = vst [vmem:[#allocation2 + $0x28] sm:$0xf] %v404_v51  ;;  %1286 = vrot.lane.b32.xlu0 %v1280_v16, %s2668_s5  ;;  %v1454_v16 = vrot.slane %v1445_v44, %v2852_v3 }
 0x164   : > { %v329_v27 = vpop.permute.xlu1 %328  ;;  %v1405_v55 = vsel %vm309_vm2, %v1401_v60, %v1402_v50  ;;  %v1404_v45 = vsel %vm1403_vm10, %v1401_v60, %v3163_v22 }
 0x165   : > { %v336_v35 = vsel %vm334_vm15, %v3295_v17, %v329_v27  ;;  %v337_v40 = vsel %vm334_vm15, %v329_v27, %v331_v52  ;;  %v325_v9 = vpop.permute.xlu0 %324 }
 0x166   : > { %344 = vst [vmem:[#allocation2 + $0x8] sm:$0xf0] %v336_v35  ;;  %345 = vst [vmem:[#allocation2 + $0x10] sm:$0xf0] %v337_v40  ;;  %v335_v46 = vsel %vm334_vm15, %v325_v9, %v3295_v17  ;;  %1076 = vrot.lane.b32.xlu1 %v3257_v42, %s2665_s11  ;;  %v1442_v9 = vld [vmem:[%s2840_s13 + $0x4] sm:$0xff] }
 0x167   : > { %343 = vst [vmem:[#allocation2] sm:$0xf0] %v335_v46  ;;  %1290 = vrot.lane.b32.xlu0 %v1281_v31, %s2668_s5  ;;  %v1458_v31 = vrot.slane %v1445_v44, %v2854_v4 }
 0x168   : > { %v466_v52 = vpop.permute.xlu1 %465 }
 0x169   : > { %v473_v48 = vsel %vm471_vm11, %v3307_v26, %v466_v52  ;;  %v474_v17 = vsel %vm471_vm11, %v466_v52, %v468_v49  ;;  %v462_v39 = vpop.permute.xlu0 %461  ;;  %v1464_v46 = vcombine.low %v1458_v31, %v1462_v10  ;;  %v1481_v31 = vld [vmem:[%s2840_s13 + $0x14] sm:$0xf] }
 0x16a   : > { %481 = vst [vmem:[#allocation2 + $0x28] sm:$0xf0] %v473_v48  ;;  %482 = vst [vmem:[#allocation2 + $0x30] sm:$0xf0] %v474_v17  ;;  %v472_v42 = vsel %vm471_vm11, %v462_v39, %v3307_v26  ;;  %1213 = vrot.lane.b32.xlu1 %v3303_v19, %s2667_s12  ;;  %v1443_v48 = vld [vmem:[%s2840_s13 + $0xc] sm:$0xff] }
 0x16b   : > { %480 = vst [vmem:[#allocation2 + $0x20] sm:$0xf0] %v472_v42  ;;  %1145 = vrot.lane.b32.xlu0 %v1142_v47, %s2666_s6  ;;  %v3411_v47 = vmul.f32 %v1404_v45, %v2995_v8  ;;  %v1375_v17 = vld [vmem:[%s2840_s13 + $0x10] sm:$0xf]  ;;  %v1507_v42 = vrot.slane %v3181_v33, 4  ;;  %s2233_s6 = scalar_lea.sflag [#allocation5], %s2836_s8 }
 0x16c   : > { %v536_v49 = vpop.permute.xlu1 %535  ;;  %v3436_v45 = vld [vmem:[%s2840_s13 + $0xc] sm:$0xff] }
 0x16d   : > { %v542_v26 = vsel %vm539_vm12, %v534_v11, %v536_v49  ;;  %v399_v62 = vpop.permute.xlu0 %398  ;;  %v1450_v11 = vrot.slane %v1445_v44, %v2850_v2  ;;  %v2013_v28 = vld [vmem:[#allocation2 + $0x8] sm:$0xff]  ;;  %v1406_v2 = vsel %vm1403_vm10, %v1405_v55, %v3160_v21  ;;  %v1412_v44 = vmul.f32 %v1402_v50, %v1375_v17 }
 0x16e   : > { %550 = vst [vmem:[#allocation2 + $0x50] sm:$0xf] %v542_v26  ;;  %v405_v19 = vsel %vm402_vm13, %v3320_v23, %v399_v62  ;;  %v406_v59 = vsel %vm402_vm13, %v399_v62, %v3290_v6  ;;  %1352 = vrot.lane.b32.xlu1 %v1348_v0, %s2669_s7  ;;  %v1349_v23 = vcombine.high %v1343_v20, %v1343_v20  ;;  %v1307_v6 = vld [vmem:[%s2840_s13 + $0x10] sm:$0xf]  ;;  %v2012_v22 = vld [vmem:[#allocation2] sm:$0xff]  ;;  %vm676_vm10 = vcmask 916480  }
 0x16f   : > { %413 = vst [vmem:[#allocation2 + $0x30] sm:$0xf] %v405_v19  ;;  %414 = vst [vmem:[#allocation2 + $0x38] sm:$0xf] %v406_v59  ;;  %1282 = vrot.lane.b32.xlu0 %v1279_v57, %s2668_s5  ;;  %v1463_v27 = vcombine.low %v1450_v11, %v1454_v16  ;;  %v1344_v52 = vmul.f32 %v1334_v25, %v1307_v6  ;;  %v1411_v39 = vmul.f32 %v1406_v2, %v3020_v36  ;;  %v2014_v36 = vld [vmem:[#allocation2 + $0x10] sm:$0xff]  ;;  %v3431_v11 = vld [vmem:[%s2840_s13 + $0x4] sm:$0xff] }
 0x170   : > { %v3394_v63 = vpop.permute.xlu1 %600  ;;  %v1468_v57 = vmul.f32 %v1464_v46, %v1443_v48  ;;  %v1510_v26 = vsel %vm309_vm2, %v1507_v42, %v1508_v41  ;;  %v1509_v16 = vsel %vm307_vm0, %v1507_v42, %v3181_v33  ;;  %v1418_v50 = vcombine.low %v1412_v44, %v1412_v44 }
 0x171   : > { %v538_v18 = vpop.permute.xlu0 %537  ;;  %v2017_v51 = vld [vmem:[#allocation2 + $0x28] sm:$0xff]  ;;  %v1467_v5 = vmul.f32 %v1463_v27, %v1442_v9  ;;  %v1417_v55 = vcombine.low %v1411_v39, %v1411_v39  ;;  %v1515_v21 = vmul.f32 %v1509_v16, %v3431_v11  ;;  %v1641_v48 = vrot.slane %v3211_v53, 4 }
 0x172   : > { %v543_v3 = vsel %vm539_vm12, %v536_v49, %v538_v18  ;;  %1356 = vrot.lane.b32.xlu1 %v1349_v23, %s2669_s7  ;;  %v2341_v35 = vpack.c.bf16 %v2017_v51, %v2013_v28  ;;  %v2016_v40 = vld [vmem:[#allocation2 + $0x20] sm:$0xff]  ;;  %1477 = vst [vmem:[#allocation2 + $0x130] sm:$0xf] %v1468_v57  ;;  %v1472_v6 = vcombine.high %v1468_v57, %v1468_v57 }
 0x173   : > { %551 = vst [vmem:[#allocation2 + $0x58] sm:$0xf] %v543_v3  ;;  %1354 = vrot.lane.b32.xlu0 %v1343_v20, %s2669_s7  ;;  %v2343_v4 = vpack.c.bf16 %v2016_v40, %v2012_v22  ;;  %v2015_v20 = vld [vmem:[#allocation2 + $0x18] sm:$0xff]  ;;  %v1471_v49 = vcombine.high %v1467_v5, %v1467_v5  ;;  %1475 = vst [vmem:[#allocation2 + $0x120] sm:$0xf] %v1467_v5  ;;  %v1511_v18 = vsel %vm307_vm0, %v1510_v26, %v3178_v29  ;;  %vm745_vm0 = vcmask 908288  }
 0x174   : > { %v605_v37 = vpop.permute.xlu1 %604  ;;  %2342 = vmatprep.subr.bf16.mxu0 %v2341_v35  ;;  %1478 = vst [vmem:[#allocation2 + $0x138] sm:$0xf] %v1472_v6  ;;  %v1516_v51 = vmul.f32 %v1511_v18, %v3436_v45  ;;  %v1517_v35 = vmul.f32 %v1508_v41, %v1481_v31  ;;  %v1574_v40 = vrot.slane %v3197_v43, 4  ;;  %v1521_v42 = vcombine.low %v1515_v21, %v1515_v21 }
 0x175   : > { %v603_v0 = vpop.permute.xlu0 %602  ;;  %2344 = vmatpush1.bf16.msra.mxu0 %v2343_v4  ;;  %1476 = vst [vmem:[#allocation2 + $0x128] sm:$0xf] %v1471_v49  ;;  %v1575_v4 = vrot.slane %v3194_v38, 4 }
 0x176   : > { %v610_v1 = vsel %vm608_vm14, %v3394_v63, %v603_v0  ;;  %v611_v8 = vsel %vm608_vm14, %v603_v0, %v605_v37  ;;  %1421 = vrot.lane.b32.xlu1 %v3411_v47, %s2670_s25  ;;  %v2019_v25 = vld [vmem:[#allocation2 + $0x38] sm:$0xff]  ;;  %v2018_v60 = vld [vmem:[#allocation2 + $0x30] sm:$0xff]  ;;  %v1522_v22 = vcombine.low %v1516_v51, %v1516_v51  ;;  %v1576_v29 = vsel %vm377_vm1, %v1574_v40, %v3197_v43 }
 0x177   : > { %618 = vst [vmem:[#allocation2 + $0x48] sm:$0xf0] %v610_v1  ;;  %619 = vst [vmem:[#allocation2 + $0x50] sm:$0xf0] %v611_v8  ;;  %1358 = vrot.lane.b32.xlu0 %v1344_v52, %s2669_s7  ;;  %v2373_v62 = vpack.c.bf16 %v2019_v25, %v2015_v20  ;;  %v2375_v19 = vpack.c.bf16 %v2018_v60, %v2014_v36  ;;  %v1523_v52 = vcombine.low %v1517_v35, %v1517_v35  ;;  %v1548_v60 = vld [vmem:[%s2840_s13 + $0x14] sm:$0xf] }
 0x178   : > { %v3426_v59 = vpop.permute.xlu1 %668  ;;  %v1640_v43 = vrot.slane %v3215_v56, 4  ;;  %v1416_v20 = vcombine.low %v3411_v47, %v3411_v47  ;;  %v3474_v49 = vmul.f32 %v1576_v29, %v3431_v11 }
 0x179   : > { %v607_v23 = vpop.permute.xlu0 %606  ;;  %2374 = vmatprep.subr.bf16.mxu1 %v2373_v62 }
 0x17a   : > { %v612_v28 = vsel %vm608_vm14, %v605_v37, %v607_v23  ;;  %1425 = vrot.lane.b32.xlu1 %v1411_v39, %s2670_s25  ;;  %2376 = vmatpush1.bf16.msra.mxu1 %v2375_v19  ;;  %v1577_v37 = vsel %vm309_vm2, %v1574_v40, %v1575_v4  ;;  %v1643_v8 = vsel %vm309_vm2, %v1640_v43, %v1641_v48 }
 0x17b   : > { %620 = vst [vmem:[#allocation2 + $0x58] sm:$0xf0] %v612_v28  ;;  %1423 = vrot.lane.b32.xlu0 %v1417_v55, %s2670_s25  ;;  %v1578_v57 = vsel %vm377_vm1, %v1577_v37, %v3194_v38  ;;  %v1588_v38 = vcombine.high %v3474_v49, %v3474_v49  ;;  %v1584_v23 = vmul.f32 %v1575_v4, %v1548_v60  ;;  %v1707_v28 = vrot.slane %v3227_v7, 4 }
 0x17c   : > { %v673_v33 = vpop.permute.xlu1 %672  ;;  %v1583_v47 = vmul.f32 %v1578_v57, %v3436_v45  ;;  %vm813_vm1 = vcmask 900096  }
 0x17d   : > { %v671_v27 = vpop.permute.xlu0 %670 }
 0x17e   : > { %v678_v10 = vsel %vm676_vm10, %v3426_v59, %v671_v27  ;;  %v679_v2 = vsel %vm676_vm10, %v671_v27, %v673_v33  ;;  %1526 = vrot.lane.b32.xlu1 %v1515_v21, %s2655_s21  ;;  %v2021_v44 = vld [vmem:[#allocation2 + $0x48] sm:$0xff]  ;;  %v1589_v18 = vcombine.high %v1583_v47, %v1583_v47 }
 0x17f   : > { %686 = vst [vmem:[#allocation2 + $0x68] sm:$0xf] %v678_v10  ;;  %687 = vst [vmem:[#allocation2 + $0x70] sm:$0xf] %v679_v2  ;;  %1427 = vrot.lane.b32.xlu0 %v1418_v50, %s2670_s25  ;;  %v1708_v50 = vrot.slane %v3223_v15, 4  ;;  %v2022_v2 = vld [vmem:[#allocation2 + $0x50] sm:$0xff] }
 0x180   : > { %v3451_v3 = vpop.permute.xlu1 %737 }
 0x181   : > { %v675_v9 = vpop.permute.xlu0 %674 }
 0x182   : > { %v680_v5 = vsel %vm676_vm10, %v673_v33, %v675_v9  ;;  %1530 = vrot.lane.b32.xlu1 %v1516_v51, %s2655_s21  ;;  %v1642_v33 = vsel %vm445_vm3, %v1640_v43, %v3215_v56  ;;  %v2023_v27 = vld [vmem:[#allocation2 + $0x58] sm:$0xff] }
 0x183   : > { %688 = vst [vmem:[#allocation2 + $0x78] sm:$0xf] %v680_v5  ;;  %1528 = vrot.lane.b32.xlu0 %v1522_v22, %s2655_s21  ;;  %v3509_v56 = vmul.f32 %v1642_v33, %v3431_v11  ;;  %v1710_v5 = vsel %vm309_vm2, %v1707_v28, %v1708_v50  ;;  %v1840_v33 = vrot.slane %v3249_v34, 4 }
 0x184   : > { %v742_v46 = vpop.permute.xlu1 %741 }
 0x185   : > { %v740_v41 = vpop.permute.xlu0 %739 }
 0x186   : > { %v747_v17 = vsel %vm745_vm0, %v3451_v3, %v740_v41  ;;  %v748_v39 = vsel %vm745_vm0, %v740_v41, %v742_v46  ;;  %1350 = vrot.lane.b32.xlu1 %v3361_v12, %s2669_s7  ;;  %v1773_v41 = vrot.slane %v3238_v61, 4 }
 0x187   : > { %755 = vst [vmem:[#allocation2 + $0x68] sm:$0xf0] %v747_v17  ;;  %756 = vst [vmem:[#allocation2 + $0x70] sm:$0xf0] %v748_v39  ;;  %1532 = vrot.lane.b32.xlu0 %v1523_v52, %s2655_s21  ;;  %v1711_v17 = vsel %vm514_vm4, %v1710_v5, %v3223_v15 }
 0x188   : > { %v530_v0 = vpop.permute.xlu1 %529 }
 0x189   : > { %v540_v12 = vsel %vm539_vm12, %v530_v0, %v3336_v58  ;;  %v744_v1 = vpop.permute.xlu0 %743  ;;  %v1644_v58 = vsel %vm445_vm3, %v1643_v8, %v3211_v53  ;;  %v1681_v8 = vld [vmem:[%s2840_s13 + $0x14] sm:$0xf]  ;;  %vm949_vm3 = vcmask 515072  }
 0x18a   : > { %548 = vst [vmem:[#allocation2 + $0x40] sm:$0xf] %v540_v12  ;;  %v749_v25 = vsel %vm745_vm0, %v742_v46, %v744_v1  ;;  %1524 = vrot.lane.b32.xlu1 %v1521_v42, %s2655_s21  ;;  %v1649_v6 = vmul.f32 %v1644_v58, %v3436_v45  ;;  %v1774_v46 = vrot.slane %v3235_v24, 4  ;;  %v1716_v12 = vmul.f32 %v1711_v17, %v3436_v45 }
 0x18b   : > { %757 = vst [vmem:[#allocation2 + $0x78] sm:$0xf0] %v749_v25  ;;  %1419 = vrot.lane.b32.xlu0 %v1416_v20, %s2670_s25  ;;  %v1717_v60 = vmul.f32 %v1708_v50, %v1681_v8  ;;  %v1880_v8 = vld [vmem:[%s2840_s13 + $0x14] sm:$0xf] }
 0x18c   : > { %v667_v36 = vpop.permute.xlu1 %666  ;;  %v1655_v22 = vcombine.low %v1649_v6, %v1649_v6  ;;  %v1776_v42 = vsel %vm309_vm2, %v1773_v41, %v1774_v46 }
 0x18d   : > { %v677_v26 = vsel %vm676_vm10, %v667_v36, %v3426_v59  ;;  %v599_v62 = vpop.permute.xlu0 %598  ;;  %v1614_v59 = vld [vmem:[%s2840_s13 + $0x14] sm:$0xf]  ;;  %v1777_v25 = vsel %vm582_vm5, %v1776_v42, %v3235_v24 }
 0x18e   : > { %685 = vst [vmem:[#allocation2 + $0x60] sm:$0xf] %v677_v26  ;;  %v609_v19 = vsel %vm608_vm14, %v599_v62, %v3394_v63  ;;  %1594 = vrot.lane.b32.xlu1 %v1583_v47, %s2656_s23  ;;  %v2025_v55 = vld [vmem:[#allocation2 + $0x68] sm:$0xff]  ;;  %v2026_v63 = vld [vmem:[#allocation2 + $0x70] sm:$0xff]  ;;  %v1650_v35 = vmul.f32 %v1641_v48, %v1614_v59  ;;  %v1782_v58 = vmul.f32 %v1777_v25, %v3436_v45  ;;  %v1973_v25 = vrot.slane %v3277_v54, 4 }
 0x18f   : > { %617 = vst [vmem:[#allocation2 + $0x40] sm:$0xf0] %v609_v19  ;;  %1592 = vrot.lane.b32.xlu0 %v1588_v38, %s2656_s23  ;;  %v2345_v16 = vpack.c.bf16 %v2025_v55, %v2021_v44  ;;  %v2379_v9 = vpack.c.bf16 %v2026_v63, %v2022_v2  ;;  %v1722_v62 = vcombine.high %v1716_v12, %v1716_v12  ;;  %v1747_v19 = vld [vmem:[%s2840_s13 + $0x14] sm:$0xf] }
 0x190   : > { %v3497_v53 = vpop.permute.xlu1 %805  ;;  %v1775_v44 = vsel %vm582_vm5, %v1773_v41, %v3238_v61  ;;  %v1842_v2 = vsel %vm651_vm6, %v1840_v33, %v3249_v34  ;;  %v1906_v34 = vrot.slane %v3264_v14, 4  ;;  %vm1086_vm5 = vcmask 457728  }
 0x191   : > { %v736_v21 = vpop.permute.xlu0 %735  ;;  %2346 = vmatprep.subr.bf16.mxu0 %v2345_v16  ;;  %v1783_v16 = vmul.f32 %v1774_v46, %v1747_v19  ;;  %v3577_v5 = vmul.f32 %v1842_v2, %v3431_v11 }
 0x192   : > { %v746_v51 = vsel %vm745_vm0, %v736_v21, %v3451_v3  ;;  %1598 = vrot.lane.b32.xlu1 %v1584_v23, %s2656_s23  ;;  %v2027_v31 = vld [vmem:[#allocation2 + $0x78] sm:$0xff]  ;;  %v1709_v3 = vsel %vm514_vm4, %v1707_v28, %v3227_v7  ;;  %v1656_v7 = vcombine.low %v1650_v35, %v1650_v35  ;;  %v1788_v23 = vcombine.low %v1782_v58, %v1782_v58 }
 0x193   : > { %754 = vst [vmem:[#allocation2 + $0x60] sm:$0xf0] %v746_v51  ;;  %1596 = vrot.lane.b32.xlu0 %v1589_v18, %s2656_s23  ;;  %v2377_v10 = vpack.c.bf16 %v2027_v31, %v2023_v27  ;;  %v3525_v48 = vmul.f32 %v1709_v3, %v3431_v11  ;;  %v1781_v18 = vmul.f32 %v1775_v44, %v3431_v11  ;;  %v1841_v51 = vrot.slane %v3246_v30, 4 }
 0x194   : > { %v810_v40 = vpop.permute.xlu1 %809  ;;  %v1789_v61 = vcombine.low %v1783_v16, %v1783_v16  ;;  %vm1018_vm4 = vcmask 506880   ;;  %v1654_v31 = vcombine.low %v3509_v56, %v3509_v56 }
 0x195   : > { %v808_v4 = vpop.permute.xlu0 %807  ;;  %2378 = vmatprep.subr.bf16.mxu1 %v2377_v10  ;;  %v1721_v15 = vcombine.high %v3525_v48, %v3525_v48 }
 0x196   : > { %v815_v52 = vsel %vm813_vm1, %v3497_v53, %v808_v4  ;;  %v816_v29 = vsel %vm813_vm1, %v808_v4, %v810_v40  ;;  %1661 = vrot.lane.b32.xlu1 %v1655_v22, %s2657_s26  ;;  %2380 = vmatpush1.bf16.msra.mxu1 %v2379_v9  ;;  %v2020_v0 = vld [vmem:[#allocation2 + $0x40] sm:$0xff]  ;;  %v1843_v22 = vsel %vm309_vm2, %v1840_v33, %v1841_v51 }
 0x197   : > { %823 = vst [vmem:[#allocation2 + $0x88] sm:$0xf] %v815_v52  ;;  %824 = vst [vmem:[#allocation2 + $0x90] sm:$0xf] %v816_v29  ;;  %1659 = vrot.lane.b32.xlu0 %v3509_v56, %s2657_s26  ;;  %v1787_v56 = vcombine.low %v1781_v18, %v1781_v18  ;;  %v1844_v46 = vsel %vm651_vm6, %v1843_v22, %v3246_v30  ;;  %v1854_v30 = vcombine.high %v3577_v5, %v3577_v5  ;;  %vm1223_vm6 = vcmask 441344  }
 0x198   : > { %v3522_v37 = vpop.permute.xlu1 %874  ;;  %v1849_v41 = vmul.f32 %v1844_v46, %v3436_v45 }
 0x199   : > { %v812_v39 = vpop.permute.xlu0 %811 }
 0x19a   : > { %v817_v43 = vsel %vm813_vm1, %v810_v40, %v812_v39  ;;  %1665 = vrot.lane.b32.xlu1 %v1656_v7, %s2657_s26  ;;  %v2024_v20 = vld [vmem:[#allocation2 + $0x60] sm:$0xff]  ;;  %v1907_v40 = vrot.slane %v3259_v32, 4  ;;  %v1814_v39 = vld [vmem:[%s2840_s13 + $0x14] sm:$0xf] }
 0x19b   : > { %825 = vst [vmem:[#allocation2 + $0x98] sm:$0xf] %v817_v43  ;;  %1663 = vrot.lane.b32.xlu0 %v1649_v6, %s2657_s26  ;;  %v2347_v57 = vpack.c.bf16 %v2024_v20, %v2020_v0 }
 0x19c   : > { %v879_v1 = vpop.permute.xlu1 %878  ;;  %v1909_v7 = vsel %vm309_vm2, %v1906_v34, %v1907_v40  ;;  %v1916_v44 = vmul.f32 %v1907_v40, %v1880_v8 }
 0x19d   : > { %v877_v47 = vpop.permute.xlu0 %876  ;;  %2348 = vmatpush1.bf16.msra.mxu0 %v2347_v57 }
 0x19e   : > { %v883_v36 = vsel %vm856_vm9, %v3522_v37, %v877_v47  ;;  %v884_v38 = vsel %vm856_vm9, %v877_v47, %v879_v1  ;;  %1727 = vrot.lane.b32.xlu1 %v1716_v12, %s2658_s28  ;;  %v1850_v12 = vmul.f32 %v1841_v51, %v1814_v39 }
 0x19f   : > { %891 = vst [vmem:[#allocation2 + $0x88] sm:$0xf0] %v883_v36  ;;  %892 = vst [vmem:[#allocation2 + $0x90] sm:$0xf0] %v884_v38  ;;  %1725 = vrot.lane.b32.xlu0 %v1721_v15, %s2658_s28  ;;  %v2671_v36 = vmov 0.0   ;;  %v1908_v38 = vsel %vm719_vm7, %v1906_v34, %v3264_v14 }
 0x1a0   : > { %v942_v26 = vpop.permute.xlu1 %941  ;;  %230 = vst [vmem:[#allocation2 + $0x1a8] sm:$0xff] %v2671_v36  ;;  %229 = vst [vmem:[#allocation2 + $0x1a0] sm:$0xff] %v2671_v36  ;;  %2217 = vmatprep.mubr.f32.mxu1 %v2671_v36  ;;  %2146 = vmatprep.mubr.f32.mxu0 %v2671_v36 }
 0x1a1   : > { %v881_v24 = vpop.permute.xlu0 %880  ;;  %231 = vst [vmem:[#allocation2 + $0x1b0] sm:$0xff] %v2671_v36  ;;  %232 = vst [vmem:[#allocation2 + $0x1b8] sm:$0xff] %v2671_v36 }
 0x1a2   : > { %v885_v55 = vsel %vm856_vm9, %v879_v1, %v881_v24  ;;  %1731 = vrot.lane.b32.xlu1 %v1717_v60, %s2658_s28  ;;  %v1974_v60 = vrot.slane %v3274_v13, 4 }
 0x1a3   : > { %893 = vst [vmem:[#allocation2 + $0x98] sm:$0xf0] %v885_v55  ;;  %1729 = vrot.lane.b32.xlu0 %v1722_v62, %s2658_s28 }
 0x1a4   : > { %v946_v6 = vpop.permute.xlu1 %945 }
 0x1a5   : > { %v944_v59 = vpop.permute.xlu0 %943 }
 0x1a6   : > { %v951_v28 = vsel %vm949_vm3, %v942_v26, %v944_v59  ;;  %v952_v21 = vsel %vm949_vm3, %v944_v59, %v946_v6  ;;  %1794 = vrot.lane.b32.xlu1 %v1788_v23, %s2659_s9  ;;  %v2030_v24 = vld [vmem:[#allocation2 + $0x90] sm:$0xff]  ;;  %v1914_v23 = vmul.f32 %v1908_v38, %v3431_v11  ;;  %v1976_v59 = vsel %vm309_vm2, %v1973_v25, %v1974_v60 }
 0x1a7   : > { %959 = vst [vmem:[#allocation2 + $0xa8] sm:$0xf] %v951_v28  ;;  %960 = vst [vmem:[#allocation2 + $0xb0] sm:$0xf] %v952_v21  ;;  %1792 = vrot.lane.b32.xlu0 %v1781_v18, %s2659_s9  ;;  %v1977_v33 = vsel %vm788_vm8, %v1976_v59, %v3274_v13  ;;  %vm1155_vm2 = vcmask 449536  }
 0x1a8   : > { %v3556_v63 = vpop.permute.xlu1 %1010  ;;  %v1982_v2 = vmul.f32 %v1977_v33, %v3436_v45  ;;  %v1920_v46 = vcombine.low %v1914_v23, %v1914_v23 }
 0x1a9   : > { %v948_v50 = vpop.permute.xlu0 %947 }
 0x1aa   : > { %v953_v27 = vsel %vm949_vm3, %v946_v6, %v948_v50  ;;  %1798 = vrot.lane.b32.xlu1 %v1789_v61, %s2659_s9  ;;  %v1975_v6 = vsel %vm788_vm8, %v1973_v25, %v3277_v54  ;;  %v1922_v61 = vcombine.low %v1916_v44, %v1916_v44  ;;  %v1988_v34 = vcombine.high %v1982_v2, %v1982_v2 }
 0x1ab   : > { %961 = vst [vmem:[#allocation2 + $0xb8] sm:$0xf] %v953_v27  ;;  %1796 = vrot.lane.b32.xlu0 %v1782_v58, %s2659_s9  ;;  %v1981_v54 = vmul.f32 %v1975_v6, %v3431_v11  ;;  %v1947_v11 = vld [vmem:[%s2840_s13 + $0x14] sm:$0xf]  ;;  %vm1360_vm8 = vcmask 384000  }
 0x1ac   : > { %v1015_v10 = vpop.permute.xlu1 %1014 }
 0x1ad   : > { %v1013_v35 = vpop.permute.xlu0 %1012  ;;  %v1987_v22 = vcombine.high %v1981_v54, %v1981_v54 }
 0x1ae   : > { %v1020_v9 = vsel %vm1018_vm4, %v3556_v63, %v1013_v35  ;;  %v1021_v3 = vsel %vm1018_vm4, %v1013_v35, %v1015_v10  ;;  %1657 = vrot.lane.b32.xlu1 %v1654_v31, %s2657_s26 }
 0x1af   : > { %1028 = vst [vmem:[#allocation2 + $0xa8] sm:$0xf0] %v1020_v9  ;;  %1029 = vst [vmem:[#allocation2 + $0xb0] sm:$0xf0] %v1021_v3  ;;  %1590 = vrot.lane.b32.xlu0 %v3474_v49, %s2656_s23  ;;  %v1983_v3 = vmul.f32 %v1974_v60, %v1947_v11 }
 0x1b0   : > { %v804_v4 = vpop.permute.xlu1 %803 }
 0x1b1   : > { %v814_v52 = vsel %vm813_vm1, %v804_v4, %v3497_v53  ;;  %v1017_v29 = vpop.permute.xlu0 %1016  ;;  %v1910_v53 = vsel %vm719_vm7, %v1909_v7, %v3259_v32  ;;  %v1855_v32 = vcombine.high %v1849_v41, %v1849_v41  ;;  %vm1292_vm7 = vcmask 392192  }
 0x1b2   : > { %822 = vst [vmem:[#allocation2 + $0x80] sm:$0xf] %v814_v52  ;;  %v1022_v49 = vsel %vm1018_vm4, %v1015_v10, %v1017_v29  ;;  %1790 = vrot.lane.b32.xlu1 %v1787_v56, %s2659_s9  ;;  %v1915_v1 = vmul.f32 %v1910_v53, %v3436_v45 }
 0x1b3   : > { %1030 = vst [vmem:[#allocation2 + $0xb8] sm:$0xf0] %v1022_v49  ;;  %1723 = vrot.lane.b32.xlu0 %v3525_v48, %s2658_s28  ;;  %v2029_v48 = vld [vmem:[#allocation2 + $0x88] sm:$0xff]  ;;  %s2334_s28 = sshll.u32 %s2836_s8, 5 }
 0x1b4   : > { %v940_v17 = vpop.permute.xlu1 %939  ;;  %v1921_v55 = vcombine.low %v1915_v1, %v1915_v1  ;;  %s228_s9 = scalar_lea.vmem [#allocation8], %s2334_s28 }
 0x1b5   : > { %v950_v42 = vsel %vm949_vm3, %v940_v17, %v942_v26  ;;  %v873_v43 = vpop.permute.xlu0 %872  ;;  %v2031_v26 = vld [vmem:[#allocation2 + $0x98] sm:$0xff] }
 0x1b6   : > { %958 = vst [vmem:[#allocation2 + $0xa0] sm:$0xf] %v950_v42  ;;  %v882_v0 = vsel %vm856_vm9, %v873_v43, %v3522_v37  ;;  %1860 = vrot.lane.b32.xlu1 %v1849_v41, %s2660_s10  ;;  %v2033_v20 = vld [vmem:[#allocation2 + $0xa8] sm:$0xff]  ;;  %v2034_v37 = vld [vmem:[#allocation2 + $0xb0] sm:$0xff]  ;;  %vm1429_vm9 = vcmask 375808  }
 0x1b7   : > { %890 = vst [vmem:[#allocation2 + $0x80] sm:$0xf0] %v882_v0  ;;  %1858 = vrot.lane.b32.xlu0 %v1854_v30, %s2660_s10  ;;  %v2349_v57 = vpack.c.bf16 %v2033_v20, %v2029_v48  ;;  %v2383_v14 = vpack.c.bf16 %v2034_v37, %v2030_v24 }
 0x1b8   : > { %v3600_v15 = vpop.permute.xlu1 %1078 }
 0x1b9   : > { %v1009_v47 = vpop.permute.xlu0 %1008  ;;  %2350 = vmatprep.subr.bf16.mxu0 %v2349_v57  ;;  %v2672_v57 = vmov 0  }
 0x1ba   : > { %v1019_v58 = vsel %vm1018_vm4, %v1009_v47, %v3556_v63  ;;  %1864 = vrot.lane.b32.xlu1 %v1850_v12, %s2660_s10  ;;  %v2035_v62 = vld [vmem:[#allocation2 + $0xb8] sm:$0xff]  ;;  %2503 = vset.pattern.permute.xlu0 %v2672_v57 }
 0x1bb   : > { %1027 = vst [vmem:[#allocation2 + $0xa0] sm:$0xf0] %v1019_v58  ;;  %1862 = vrot.lane.b32.xlu0 %v1855_v32, %s2660_s10  ;;  %v2381_v19 = vpack.c.bf16 %v2035_v62, %v2031_v26  ;;  %2502 = vset.pattern.permute.xlu1 %v2672_v57 }
 0x1bc   : > { %v1083_v16 = vpop.permute.xlu1 %1082 }
 0x1bd   : > { %v1081_v18 = vpop.permute.xlu0 %1080  ;;  %2382 = vmatprep.subr.bf16.mxu1 %v2381_v19 }
 0x1be   : > { %v1088_v28 = vsel %vm1086_vm5, %v3600_v15, %v1081_v18  ;;  %v1089_v21 = vsel %vm1086_vm5, %v1081_v18, %v1083_v16  ;;  %1927 = vrot.lane.b32.xlu1 %v1921_v55, %s2661_s14  ;;  %2384 = vmatpush1.bf16.msra.mxu1 %v2383_v14  ;;  %v2028_v27 = vld [vmem:[#allocation2 + $0x80] sm:$0xff] }
 0x1bf   : > { %1096 = vst [vmem:[#allocation2 + $0xc8] sm:$0xf] %v1088_v28  ;;  %1097 = vst [vmem:[#allocation2 + $0xd0] sm:$0xf] %v1089_v21  ;;  %1925 = vrot.lane.b32.xlu0 %v1914_v23, %s2661_s14 }
 0x1c0   : > { %v3620_v63 = vpop.permute.xlu1 %1147 }
 0x1c1   : > { %v1085_v50 = vpop.permute.xlu0 %1084 }
 0x1c2   : > { %v1090_v51 = vsel %vm1086_vm5, %v1083_v16, %v1085_v50  ;;  %1931 = vrot.lane.b32.xlu1 %v1922_v61, %s2661_s14  ;;  %v2032_v31 = vld [vmem:[#allocation2 + $0xa0] sm:$0xff] }
 0x1c3   : > { %1098 = vst [vmem:[#allocation2 + $0xd8] sm:$0xf] %v1090_v51  ;;  %1929 = vrot.lane.b32.xlu0 %v1915_v1, %s2661_s14  ;;  %v2351_v10 = vpack.c.bf16 %v2032_v31, %v2028_v27 }
 0x1c4   : > { %v1152_v35 = vpop.permute.xlu1 %1151 }
 0x1c5   : > { %v1150_v40 = vpop.permute.xlu0 %1149  ;;  %2352 = vmatpush1.bf16.msra.mxu0 %v2351_v10 }
 0x1c6   : > { %v1157_v13 = vsel %vm1155_vm2, %v3620_v63, %v1150_v40  ;;  %v1158_v9 = vsel %vm1155_vm2, %v1150_v40, %v1152_v35  ;;  %1993 = vrot.lane.b32.xlu1 %v1982_v2, %s2662_s20 }
 0x1c7   : > { %1165 = vst [vmem:[#allocation2 + $0xc8] sm:$0xf0] %v1157_v13  ;;  %1166 = vst [vmem:[#allocation2 + $0xd0] sm:$0xf0] %v1158_v9  ;;  %1991 = vrot.lane.b32.xlu0 %v1987_v22, %s2662_s20 }
 0x1c8   : > { %v1216_v56 = vpop.permute.xlu1 %1215 }
 0x1c9   : > { %v1154_v45 = vpop.permute.xlu0 %1153 }
 0x1ca   : > { %v1159_v4 = vsel %vm1155_vm2, %v1152_v35, %v1154_v45  ;;  %1997 = vrot.lane.b32.xlu1 %v1983_v3, %s2662_s20 }
 0x1cb   : > { %1167 = vst [vmem:[#allocation2 + $0xd8] sm:$0xf0] %v1159_v4  ;;  %1995 = vrot.lane.b32.xlu0 %v1988_v34, %s2662_s20 }
 0x1cc   : > { %v1220_v52 = vpop.permute.xlu1 %1219 }
 0x1cd   : > { %v1218_v29 = vpop.permute.xlu0 %1217 }
 0x1ce   : > { %v1225_v7 = vsel %vm1223_vm6, %v1216_v56, %v1218_v29  ;;  %v1226_v49 = vsel %vm1223_vm6, %v1218_v29, %v1220_v52  ;;  %1923 = vrot.lane.b32.xlu1 %v1920_v46, %s2661_s14  ;;  %v2037_v47 = vld [vmem:[#allocation2 + $0xc8] sm:$0xff]  ;;  %v2038_v24 = vld [vmem:[#allocation2 + $0xd0] sm:$0xff]  ;;  %s2247_s14 = sshll.u32 %s228_s9, 4  ;;  %s3707_s14 = int_to_ptr.vmem [resolvable:$true] %s2247_s14 }
 0x1cf   : > { %1233 = vst [vmem:[#allocation2 + $0xe8] sm:$0xf] %v1225_v7  ;;  %1234 = vst [vmem:[#allocation2 + $0xf0] sm:$0xf] %v1226_v49  ;;  %1856 = vrot.lane.b32.xlu0 %v3577_v5, %s2660_s10  ;;  %v2076_v5 = vld [vmem:[%s3751_s2] sm:$0xff]  ;;  %s2340_s10 = sshll.u32 %s2721_s19, 9 }
 0x1d0   : > { %v1285_v41 = vpop.permute.xlu1 %1284  ;;  %s3705_s11 = scalar_lea.hbm %s3753_s4, %s2340_s10  ;;  %s2562_s12 = scalar_lea.vmem %s3707_s14, 512 }
 0x1d1   : > { %v1222_v17 = vpop.permute.xlu0 %1221  ;;  %p2563_p4 = scmp.ne.s32.totalorder %s3707_s14, %s2562_s12  ;;  %s2674_s19 = smov [#allocation8]  }
 0x1d2   : > { %v1227_v30 = vsel %vm1223_vm6, %v1220_v52, %v1222_v17  ;;  %2079 = vperm.xlu1 %2502, %v2076_v5   ;;  %v2039_v26 = vld [vmem:[#allocation2 + $0xd8] sm:$0xff]  ;;  %s2566_s5 = sshll.u32 %s2674_s19, 4  ;;  %s2567_s5 = int_to_ptr.vmem [resolvable:$false] %s2566_s5 }
 0x1d3   : > { %1235 = vst [vmem:[#allocation2 + $0xf8] sm:$0xf] %v1227_v30  ;;  %1989 = vrot.lane.b32.xlu0 %v1981_v54, %s2662_s20  ;;  %p2564_p6 = pnand %p2563_p4, %p2791_p12  ;;  %s2568_s7 = scalar_lea.vmem %s2567_s5, 1024 }
 0x1d4   : > { %v1289_v39 = vpop.permute.xlu1 %1288  ;;  %p2569_p10 = scmp.lt.s32.totalorder %s3707_s14, %s2567_s5  ;;  %p2570_p11 = scmp.lt.s32.totalorder %s2568_s7, %s2562_s12 }
 0x1d5   : > { %v1287_v53 = vpop.permute.xlu0 %1286  ;;  %p2565_p8 = pneg %p2564_p6 }
 0x1d6   : > { %v1294_v42 = vsel %vm1292_vm7, %v1285_v41, %v1287_v53  ;;  %v1295_v43 = vsel %vm1292_vm7, %v1287_v53, %v1289_v39  ;;  %p2571_p3 = por %p2570_p11, %p2569_p10 }
 0x1d7   : > { %1302 = vst [vmem:[#allocation2 + $0xe8] sm:$0xf0] %v1294_v42  ;;  %1303 = vst [vmem:[#allocation2 + $0xf0] sm:$0xf0] %v1295_v43 }
 0x1d8   : > { %v1077_v0 = vpop.permute.xlu1 %1076  ;;  %p2572_p7 = pnand %p2571_p3, %p2565_p8 }
 0x1d9   : > { %v1087_v48 = vsel %vm1086_vm5, %v1077_v0, %v3600_v15  ;;  %v1291_v20 = vpop.permute.xlu0 %1290 }
 0x1da   : > { %1095 = vst [vmem:[#allocation2 + $0xc0] sm:$0xf] %v1087_v48  ;;  %v1296_v12 = vsel %vm1292_vm7, %v1289_v39, %v1291_v20 }
 0x1db   : > { %1304 = vst [vmem:[#allocation2 + $0xf8] sm:$0xf0] %v1296_v12 }
 0x1dc   : > { %v1214_v1 = vpop.permute.xlu1 %1213 }
 0x1dd   : > { %v1224_v32 = vsel %vm1223_vm6, %v1214_v1, %v1216_v56  ;;  %v1146_v8 = vpop.permute.xlu0 %1145 }
 0x1de   : > { %1232 = vst [vmem:[#allocation2 + $0xe0] sm:$0xf] %v1224_v32  ;;  %v1156_v25 = vsel %vm1155_vm2, %v1146_v8, %v3620_v63  ;;  %v2041_v37 = vld [vmem:[#allocation2 + $0xe8] sm:$0xff]  ;;  %v2042_v60 = vld [vmem:[#allocation2 + $0xf0] sm:$0xff] }
 0x1df   : > { %1164 = vst [vmem:[#allocation2 + $0xc0] sm:$0xf0] %v1156_v25  ;;  %v2353_v15 = vpack.c.bf16 %v2041_v37, %v2037_v47  ;;  %v2387_v55 = vpack.c.bf16 %v2042_v60, %v2038_v24 }
 0x1e0   : > { %v1353_v36 = vpop.permute.xlu1 %1352 }
 0x1e1   : > { %v1283_v38 = vpop.permute.xlu0 %1282  ;;  %2354 = vmatprep.subr.bf16.mxu0 %v2353_v15 }
 0x1e2   : > { %v1293_v58 = vsel %vm1292_vm7, %v1283_v38, %v1285_v41  ;;  %v2043_v62 = vld [vmem:[#allocation2 + $0xf8] sm:$0xff] }
 0x1e3   : > { %1301 = vst [vmem:[#allocation2 + $0xe0] sm:$0xf0] %v1293_v58  ;;  %v2385_v19 = vpack.c.bf16 %v2043_v62, %v2039_v26 }
 0x1e4   : > { %v1357_v44 = vpop.permute.xlu1 %1356 }
 0x1e5   : > { %v1355_v16 = vpop.permute.xlu0 %1354  ;;  %2386 = vmatprep.subr.bf16.mxu1 %v2385_v19 }
 0x1e6   : > { %v1362_v14 = vsel %vm1360_vm8, %v1353_v36, %v1355_v16  ;;  %v1363_v23 = vsel %vm1360_vm8, %v1355_v16, %v1357_v44  ;;  %2388 = vmatpush1.bf16.msra.mxu1 %v2387_v55  ;;  %v2036_v28 = vld [vmem:[#allocation2 + $0xc0] sm:$0xff] }
 0x1e7   : > { %1370 = vst [vmem:[#allocation2 + $0x108] sm:$0xf] %v1362_v14  ;;  %1371 = vst [vmem:[#allocation2 + $0x110] sm:$0xf] %v1363_v23 }
 0x1e8   : > { %v1422_v6 = vpop.permute.xlu1 %1421 }
 0x1e9   : > { %v1359_v18 = vpop.permute.xlu0 %1358 }
 0x1ea   : > { %v1364_v59 = vsel %vm1360_vm8, %v1357_v44, %v1359_v18  ;;  %v2040_v21 = vld [vmem:[#allocation2 + $0xe0] sm:$0xff] }
 0x1eb   : > { %1372 = vst [vmem:[#allocation2 + $0x118] sm:$0xf] %v1364_v59  ;;  %v2355_v61 = vpack.c.bf16 %v2040_v21, %v2036_v28 }
 0x1ec   : > { %v1426_v63 = vpop.permute.xlu1 %1425 }
 0x1ed   : > { %v1424_v54 = vpop.permute.xlu0 %1423  ;;  %2356 = vmatpush1.bf16.msra.mxu0 %v2355_v61 }
 0x1ee   : > { %v1431_v33 = vsel %vm1429_vm9, %v1422_v6, %v1424_v54  ;;  %v1432_v50 = vsel %vm1429_vm9, %v1424_v54, %v1426_v63 }
 0x1ef   : > { %1439 = vst [vmem:[#allocation2 + $0x108] sm:$0xf0] %v1431_v33  ;;  %1440 = vst [vmem:[#allocation2 + $0x110] sm:$0xf0] %v1432_v50 }
 0x1f0   : > { %v1527_v51 = vpop.permute.xlu1 %1526 }
 0x1f1   : > { %v1428_v27 = vpop.permute.xlu0 %1427 }
 0x1f2   : > { %v1433_v31 = vsel %vm1429_vm9, %v1426_v63, %v1428_v27 }
 0x1f3   : > { %1441 = vst [vmem:[#allocation2 + $0x118] sm:$0xf0] %v1433_v31 }
 0x1f4   : > { %v1531_v10 = vpop.permute.xlu1 %1530 }
 0x1f5   : > { %v1529_v2 = vpop.permute.xlu0 %1528 }
 0x1f6   : > { %v1535_v35 = vsel %vm334_vm15, %v1527_v51, %v1529_v2  ;;  %v1536_v22 = vsel %vm334_vm15, %v1529_v2, %v1531_v10  ;;  %v2045_v4 = vld [vmem:[#allocation2 + $0x108] sm:$0xff]  ;;  %v2046_v53 = vld [vmem:[#allocation2 + $0x110] sm:$0xff] }
 0x1f7   : > { %1543 = vst [vmem:[#allocation2 + $0x128] sm:$0xf0] %v1535_v35  ;;  %1544 = vst [vmem:[#allocation2 + $0x130] sm:$0xf0] %v1536_v22 }
 0x1f8   : > { %v1351_v11 = vpop.permute.xlu1 %1350 }
 0x1f9   : > { %v1361_v40 = vsel %vm1360_vm8, %v1351_v11, %v1353_v36  ;;  %v1533_v13 = vpop.permute.xlu0 %1532 }
 0x1fa   : > { %1369 = vst [vmem:[#allocation2 + $0x100] sm:$0xf] %v1361_v40  ;;  %v1537_v9 = vsel %vm334_vm15, %v1531_v10, %v1533_v13  ;;  %v2047_v17 = vld [vmem:[#allocation2 + $0x118] sm:$0xff] }
 0x1fb   : > { %1545 = vst [vmem:[#allocation2 + $0x138] sm:$0xf0] %v1537_v9 }
 0x1fc   : > { %v1525_v3 = vpop.permute.xlu1 %1524 }
 0x1fd   : > { %v1534_v56 = vsel %vm334_vm15, %v1525_v3, %v1527_v51  ;;  %v1420_v34 = vpop.permute.xlu0 %1419 }
 0x1fe   : > { %1542 = vst [vmem:[#allocation2 + $0x120] sm:$0xf0] %v1534_v56  ;;  %v1430_v45 = vsel %vm1429_vm9, %v1420_v34, %v1422_v6  ;;  %v2049_v46 = vld [vmem:[#allocation2 + $0x128] sm:$0xff]  ;;  %v2050_v49 = vld [vmem:[#allocation2 + $0x130] sm:$0xff] }
 0x1ff   : > { %1438 = vst [vmem:[#allocation2 + $0x100] sm:$0xf0] %v1430_v45  ;;  %v2357_v52 = vpack.c.bf16 %v2049_v46, %v2045_v4  ;;  %v2391_v43 = vpack.c.bf16 %v2050_v49, %v2046_v53 }
 0x200   : > { %v1595_v29 = vpop.permute.xlu1 %1594 }
 0x201   : > { %v1593_v7 = vpop.permute.xlu0 %1592  ;;  %2358 = vmatprep.subr.bf16.mxu0 %v2357_v52 }
 0x202   : > { %v1601_v41 = vsel %vm402_vm13, %v1593_v7, %v1595_v29  ;;  %v2051_v30 = vld [vmem:[#allocation2 + $0x138] sm:$0xff] }
 0x203   : > { %1609 = vst [vmem:[#allocation2 + $0x148] sm:$0xf] %v1601_v41  ;;  %v2389_v39 = vpack.c.bf16 %v2051_v30, %v2047_v17 }
 0x204   : > { %v1599_v42 = vpop.permute.xlu1 %1598 }
 0x205   : > { %v1597_v0 = vpop.permute.xlu0 %1596  ;;  %2390 = vmatprep.subr.bf16.mxu1 %v2389_v39  ;;  %v2048_v5 = vld [vmem:[#allocation2 + $0x120] sm:$0xff] }
 0x206   : > { %v1602_v48 = vsel %vm402_vm13, %v1595_v29, %v1597_v0  ;;  %v1603_v20 = vsel %vm402_vm13, %v1597_v0, %v1599_v42  ;;  %2392 = vmatpush1.bf16.msra.mxu1 %v2391_v43  ;;  %v2044_v57 = vld [vmem:[#allocation2 + $0x100] sm:$0xff] }
 0x207   : > { %1610 = vst [vmem:[#allocation2 + $0x150] sm:$0xf] %v1602_v48  ;;  %1611 = vst [vmem:[#allocation2 + $0x158] sm:$0xf] %v1603_v20  ;;  %v2359_v12 = vpack.c.bf16 %v2048_v5, %v2044_v57 }
 0x208   : > { %v1662_v1 = vpop.permute.xlu1 %1661 }
 0x209   : > { %v1660_v32 = vpop.permute.xlu0 %1659  ;;  %2360 = vmatpush1.bf16.msra.mxu0 %v2359_v12 }
 0x20a   : > { %v1668_v8 = vsel %vm471_vm11, %v1660_v32, %v1662_v1 }
 0x20b   : > { %1676 = vst [vmem:[#allocation2 + $0x148] sm:$0xf0] %v1668_v8 }
 0x20c   : > { %v1666_v25 = vpop.permute.xlu1 %1665 }
 0x20d   : > { %v1664_v47 = vpop.permute.xlu0 %1663 }
 0x20e   : > { %v1669_v37 = vsel %vm471_vm11, %v1662_v1, %v1664_v47  ;;  %v1670_v15 = vsel %vm471_vm11, %v1664_v47, %v1666_v25 }
 0x20f   : > { %1677 = vst [vmem:[#allocation2 + $0x150] sm:$0xf0] %v1669_v37  ;;  %1678 = vst [vmem:[#allocation2 + $0x158] sm:$0xf0] %v1670_v15 }
 0x210   : > { %v1728_v36 = vpop.permute.xlu1 %1727 }
 0x211   : > { %v1726_v38 = vpop.permute.xlu0 %1725 }
 0x212   : > { %v1734_v60 = vsel %vm539_vm12, %v1726_v38, %v1728_v36  ;;  %v2053_v61 = vld [vmem:[#allocation2 + $0x148] sm:$0xff] }
 0x213   : > { %1742 = vst [vmem:[#allocation2 + $0x168] sm:$0xf] %v1734_v60 }
 0x214   : > { %v1732_v58 = vpop.permute.xlu1 %1731 }
 0x215   : > { %v1730_v26 = vpop.permute.xlu0 %1729 }
 0x216   : > { %v1735_v62 = vsel %vm539_vm12, %v1728_v36, %v1730_v26  ;;  %v1736_v19 = vsel %vm539_vm12, %v1730_v26, %v1732_v58  ;;  %v2055_v27 = vld [vmem:[#allocation2 + $0x158] sm:$0xff]  ;;  %v2054_v2 = vld [vmem:[#allocation2 + $0x150] sm:$0xff] }
 0x217   : > { %1743 = vst [vmem:[#allocation2 + $0x170] sm:$0xf] %v1735_v62  ;;  %1744 = vst [vmem:[#allocation2 + $0x178] sm:$0xf] %v1736_v19  ;;  %v2673_v19 = vmov 0.0|0.0  }
 0x218   : > { %v1795_v24 = vpop.permute.xlu1 %1794 }
 0x219   : > { %v1793_v44 = vpop.permute.xlu0 %1792 }
 0x21a   : > { %v1801_v55 = vsel %vm608_vm14, %v1793_v44, %v1795_v24 }
 0x21b   : > { %1809 = vst [vmem:[#allocation2 + $0x168] sm:$0xf0] %v1801_v55  ;;  %v2011_v55 = vld [vmem:[%s3750_s1] sm:$0xff] }
 0x21c   : > { %v1799_v16 = vpop.permute.xlu1 %1798 }
 0x21d   : > { %v1797_v14 = vpop.permute.xlu0 %1796 }
 0x21e   : > { %v1802_v23 = vsel %vm608_vm14, %v1795_v24, %v1797_v14  ;;  %v1803_v6 = vsel %vm608_vm14, %v1797_v14, %v1799_v16 }
 0x21f   : > { %1810 = vst [vmem:[#allocation2 + $0x170] sm:$0xf0] %v1802_v23  ;;  %1811 = vst [vmem:[#allocation2 + $0x178] sm:$0xf0] %v1803_v6 }
 0x220   : > { %v1658_v18 = vpop.permute.xlu1 %1657 }
 0x221   : > { %v1667_v59 = vsel %vm471_vm11, %v1658_v18, %v1660_v32  ;;  %v1591_v28 = vpop.permute.xlu0 %1590 }
 0x222   : > { %1675 = vst [vmem:[#allocation2 + $0x140] sm:$0xf0] %v1667_v59  ;;  %v1600_v21 = vsel %vm402_vm13, %v1591_v28, %v1593_v7  ;;  %v2057_v63 = vld [vmem:[#allocation2 + $0x168] sm:$0xff] }
 0x223   : > { %1608 = vst [vmem:[#allocation2 + $0x140] sm:$0xf] %v1600_v21  ;;  %v2361_v54 = vpack.c.bf16 %v2057_v63, %v2053_v61 }
 0x224   : > { %v1791_v33 = vpop.permute.xlu1 %1790 }
 0x225   : > { %v1800_v50 = vsel %vm608_vm14, %v1791_v33, %v1793_v44  ;;  %v1724_v51 = vpop.permute.xlu0 %1723  ;;  %2362 = vmatprep.subr.bf16.mxu0 %v2361_v54 }
 0x226   : > { %1808 = vst [vmem:[#allocation2 + $0x160] sm:$0xf0] %v1800_v50  ;;  %v1733_v31 = vsel %vm539_vm12, %v1724_v51, %v1726_v38  ;;  %v2059_v10 = vld [vmem:[#allocation2 + $0x178] sm:$0xff]  ;;  %v2058_v35 = vld [vmem:[#allocation2 + $0x170] sm:$0xff] }
 0x227   : > { %1741 = vst [vmem:[#allocation2 + $0x160] sm:$0xf] %v1733_v31  ;;  %v2393_v22 = vpack.c.bf16 %v2059_v10, %v2055_v27  ;;  %v2395_v11 = vpack.c.bf16 %v2058_v35, %v2054_v2 }
 0x228   : > { %v1861_v40 = vpop.permute.xlu1 %1860 }
 0x229   : > { %v1859_v13 = vpop.permute.xlu0 %1858  ;;  %2394 = vmatprep.subr.bf16.mxu1 %v2393_v22 }
 0x22a   : > { %v1867_v9 = vsel %vm676_vm10, %v1859_v13, %v1861_v40  ;;  %2396 = vmatpush1.bf16.msra.mxu1 %v2395_v11  ;;  %v2052_v4 = vld [vmem:[#allocation2 + $0x140] sm:$0xff] }
 0x22b   : > { %1875 = vst [vmem:[#allocation2 + $0x188] sm:$0xf] %v1867_v9 }
 0x22c   : > { %v1865_v3 = vpop.permute.xlu1 %1864 }
 0x22d   : > { %v1863_v56 = vpop.permute.xlu0 %1862 }
 0x22e   : > { %v1868_v34 = vsel %vm676_vm10, %v1861_v40, %v1863_v56  ;;  %v1869_v45 = vsel %vm676_vm10, %v1863_v56, %v1865_v3  ;;  %v2056_v46 = vld [vmem:[#allocation2 + $0x160] sm:$0xff] }
 0x22f   : > { %1876 = vst [vmem:[#allocation2 + $0x190] sm:$0xf] %v1868_v34  ;;  %1877 = vst [vmem:[#allocation2 + $0x198] sm:$0xf] %v1869_v45  ;;  %v2363_v52 = vpack.c.bf16 %v2056_v46, %v2052_v4 }
 0x230   : > { %v1928_v29 = vpop.permute.xlu1 %1927 }
 0x231   : > { %v1926_v7 = vpop.permute.xlu0 %1925  ;;  %2364 = vmatpush1.bf16.msra.mxu0 %v2363_v52 }
 0x232   : > { %v1934_v49 = vsel %vm745_vm0, %v1926_v7, %v1928_v29 }
 0x233   : > { %1942 = vst [vmem:[#allocation2 + $0x188] sm:$0xf0] %v1934_v49 }
 0x234   : > { %v1932_v41 = vpop.permute.xlu1 %1931 }
 0x235   : > { %v1930_v17 = vpop.permute.xlu0 %1929 }
 0x236   : > { %v1935_v30 = vsel %vm745_vm0, %v1928_v29, %v1930_v17  ;;  %v1936_v39 = vsel %vm745_vm0, %v1930_v17, %v1932_v41 }
 0x237   : > { %1943 = vst [vmem:[#allocation2 + $0x190] sm:$0xf0] %v1935_v30  ;;  %1944 = vst [vmem:[#allocation2 + $0x198] sm:$0xf0] %v1936_v39 }
 0x238   : > { %v1994_v53 = vpop.permute.xlu1 %1993 }
 0x239   : > { %v1992_v42 = vpop.permute.xlu0 %1991 }
 0x23a   : > { %v2000_v43 = vsel %vm813_vm1, %v1992_v42, %v1994_v53  ;;  %v2061_v8 = vld [vmem:[#allocation2 + $0x188] sm:$0xff] }
 0x23b   : > { %2008 = vst [vmem:[#allocation2 + $0x1a8] sm:$0xf] %v2000_v43 }
 0x23c   : > { %v1998_v0 = vpop.permute.xlu1 %1997 }
 0x23d   : > { %v1996_v5 = vpop.permute.xlu0 %1995 }
 0x23e   : > { %v2001_v48 = vsel %vm813_vm1, %v1994_v53, %v1996_v5  ;;  %v2002_v20 = vsel %vm813_vm1, %v1996_v5, %v1998_v0  ;;  %v2063_v15 = vld [vmem:[#allocation2 + $0x198] sm:$0xff]  ;;  %v2062_v60 = vld [vmem:[#allocation2 + $0x190] sm:$0xff] }
 0x23f   : > { %2009 = vst [vmem:[#allocation2 + $0x1b0] sm:$0xf] %v2001_v48  ;;  %2010 = vst [vmem:[#allocation2 + $0x1b8] sm:$0xf] %v2002_v20 }
 0x240   : > { %v1924_v57 = vpop.permute.xlu1 %1923 }
 0x241   : > { %v1933_v12 = vsel %vm745_vm0, %v1924_v57, %v1926_v7  ;;  %v1857_v1 = vpop.permute.xlu0 %1856 }
 0x242   : > { %1941 = vst [vmem:[#allocation2 + $0x180] sm:$0xf0] %v1933_v12  ;;  %v1866_v32 = vsel %vm676_vm10, %v1857_v1, %v1859_v13  ;;  %v2065_v25 = vld [vmem:[#allocation2 + $0x1a8] sm:$0xff] }
 0x243   : > { %1874 = vst [vmem:[#allocation2 + $0x180] sm:$0xf] %v1866_v32  ;;  %v2365_v47 = vpack.c.bf16 %v2065_v25, %v2061_v8 }
 0x245   : > { %v1990_v37 = vpop.permute.xlu0 %1989  ;;  %2366 = vmatprep.subr.bf16.mxu0 %v2365_v47 }
 0x246   : > { %v1999_v36 = vsel %vm813_vm1, %v1990_v37, %v1992_v42  ;;  %v2067_v38 = vld [vmem:[#allocation2 + $0x1b8] sm:$0xff]  ;;  %v2066_v58 = vld [vmem:[#allocation2 + $0x1b0] sm:$0xff] }
 0x247   : > { %2007 = vst [vmem:[#allocation2 + $0x1a0] sm:$0xf] %v1999_v36  ;;  %v2397_v26 = vpack.c.bf16 %v2067_v38, %v2063_v15  ;;  %v2399_v62 = vpack.c.bf16 %v2066_v58, %v2062_v60 }
 0x249   : > { %2398 = vmatprep.subr.bf16.mxu1 %v2397_v26 }
 0x24a   : > { %2400 = vmatpush1.bf16.msra.mxu1 %v2399_v62  ;;  %v2060_v24 = vld [vmem:[#allocation2 + $0x180] sm:$0xff] }
 0x24b   : > { %2402 = vmatprep.subr.bf16.mxu1 %v2673_v19 }
 0x24e   : > { %v2064_v44 = vld [vmem:[#allocation2 + $0x1a0] sm:$0xff]  ;;  %2404 = vmatpush1.bf16.msra.mxu1 %v2673_v19 }
 0x24f   : > { %v2367_v16 = vpack.c.bf16 %v2064_v44, %v2060_v24 }
 0x251   : > { %2368 = vmatpush1.bf16.msra.mxu0 %v2367_v16  ;;  %2218 = vmatmul.mubr.f32.vlgmr.msra.gmra.mrb[0].mxu1 %v2011_v55  ;;  %v2080_v14 = vpop.permute.xlu1 %2079 }
 0x252   : > { %2370 = vmatprep.subr.bf16.mxu0 %v2673_v19 }
 0x255   : > { %2372 = vmatpush1.bf16.msra.mxu0 %v2673_v19 }
 0x258   : > { %2147 = vmatmul.mubr.f32.vlgmr.msra.gmra.mrb[0].mxu0 %v2011_v55 }
 0x324   : > { %v2219_v23 = vpop.f32.mrb[0].mxu1 }
 0x325   : > { %v2220_v6 = vadd.f32 %v2219_v23, %v2080_v14  ;;  %v2221_v18 = vpop.f32.mrb[1].mxu1 }
 0x326   : > { %v2222_v59 = vadd.f32 %v2221_v18, %v2080_v14 }
 0x327   : > { %v2226_v28 = vmax.f32 %v2220_v6, 0.0 }
 0x328   : > { %v2227_v21 = vmax.f32 %v2222_v59, 0.0 }
 0x329   : > { %2230 = vst [vmem:[%s228_s9 + $0x10] sm:$0xff] %v2226_v28 }
 0x32a   : > { %2231 = vst [vmem:[%s228_s9 + $0x18] sm:$0xff] %v2227_v21 }
 0x32b   : > { %v2148_v61 = vpop.f32.mrb[0].mxu0 }
 0x32c   : > { %v2149_v63 = vadd.f32 %v2148_v61, %v2080_v14  ;;  %v2150_v54 = vpop.f32.mrb[1].mxu0 }
 0x32d   : > { %v2151_v33 = vadd.f32 %v2150_v54, %v2080_v14 }
 0x32e   : > { %v2224_v50 = vmax.f32 %v2149_v63, 0.0 }
 0x32f   : > { %v2225_v51 = vmax.f32 %v2151_v33, 0.0 }
 0x330   : > { %2228 = vst [vmem:[%s228_s9] sm:$0xff] %v2224_v50 }
 0x331   : > { %2229 = vst [vmem:[%s228_s9 + $0x8] sm:$0xff] %v2225_v51 }
 0x332   : > { %2575 = shalt.err (!%p2572_p7)
}
 0x333   : > { %s2576_s8 = scalar_lea.hbm %s3705_s11, 512  ;;  %s2580_s21 = scalar_lea.hbm %s3753_s4, 1024 }
 0x334   : > { %p2577_p9 = scmp.ne.s32.totalorder %s3705_s11, %s2576_s8  ;;  %p2581_p0 = scmp.lt.u32.totalorder %s3705_s11, %s3753_s4 }
 0x335   : > { %p2582_p13 = scmp.lt.u32.totalorder %s2580_s21, %s2576_s8  ;;  %p2584_p4 = scmp.lt.u32.totalorder %s2576_s8, %s3705_s11 }
 0x336   : > { %p2578_p2 = pnand %p2577_p9, %p2791_p12 }
 0x337   : > { %p2583_p1 = por %p2582_p13, %p2581_p0 }
 0x338   : > { %p2579_p5 = pneg %p2578_p2 }
 0x339   : > { %p2585_p6 = por %p2584_p4, %p2583_p1 }
 0x33b   : > { %p2586_p8 = pnand %p2585_p6, %p2579_p5 }
 0x33d   : > { %2589 = shalt.err (!%p2586_p8)
}
 0x33e   : > { %2414 = dma.vmem_to_hbm [thread:$0]  (%p2791_p12), %s3707_s14, 512, %s3705_s11, %s2233_s6  }
 0x33f PF: > { %s2259_s28 = sand.u32 1, %s2620_s15   ;;  %p3768_p10 = scmp.ne.s32.totalorder %s3758_s22, 0 }
 0x340   : > { %p3769_p11 = scmp.ge.s32.totalorder %s2632_s18, 2  ;;  %s2260_s9 = scalar_lea.sflag [#allocation5], %s2259_s28 }
 0x342   : > { %p2425_p3 = pnand %p3769_p11, %p3768_p10 }
 0x344   : > { %2615 = dma.done.wait (!%p2425_p3), %s2260_s9, 512  }
 0x345   : > { %2617 = vsyncadd (!%p2425_p3), %s2260_s9, 4294966784  ;;  %p18_p7 = scmp.ge.s32.totalorder %s2756_s27, 4   ;;  %s3770_s15 = smov %s2624_s16 }
 0x346   : > { %s3771_s16 = smov %s2628_s17  ;;  %s3772_s17 = smov %s2787_s24 }
 0x347   : > { %s3773_s18 = smov %s2756_s27  ;;  %20 = sbr.rel (!%p18_p7) target bundleno = 6 (0x6), region = 111 }
 0x34e   :  { %2265 = vsyncpa [#allocation4], 1 }
 0x34f   :  { %2267 = vsyncpa [#allocation4 + $0x1], 1 }
 0x350   :  { %2268 = vsyncpa [#allocation7], 1 }
 0x351   :  { %2269 = vsyncpa [#allocation5], 1 }
 0x352   :  { %2271 = vsyncpa [#allocation5 + $0x1], 1 }

</bundles_post_ra>
